<compile_context>
chip_gen: v7x
topology: tpu7x:2x2x1
jax: 0.10.0
libtpu: 0.0.40
codegen_flags: <defaults>
</compile_context>

<pallas_src>
import jax
import jax.numpy as jnp
from jax.experimental import pallas as pl
from jax.experimental.pallas import tpu as pltpu

_EPS = 1e-5


def resnet_block_kernel(x_ref, w1_ref, w2_ref, out_ref):
    """x_ref/out_ref: (1, H, W, C) f32; w*_ref: (3, 3*C, C) bf16 laid out as
    (dy, dx*C + cin, cout)."""
    H, W, C = out_ref.shape[1], out_ref.shape[2], out_ref.shape[3]

    def conv3x3(img_bf16, w_ref):
        # img_bf16: (H, W, C) bf16; w_ref: (3, 3C, C) bf16.  Returns (H*W, C) f32.
        # Row reflect-pad: (H, W, C) -> (H+2, W, C); leading-dim concat (cheap).
        rows = jnp.concatenate(
            [img_bf16[1:2], img_bf16, img_bf16[H - 2:H - 1]], axis=0)
        # Column reflect-pad fused into the dx-tap folding.  With padded cols
        # P[0]=img[1], P[1..W]=img[0..W-1], P[W+1]=img[W-2]:
        #   dx=0 tap uses P[0..W-1]   = [img[1],  img[0..W-2]]
        #   dx=1 tap uses P[1..W]     =  img[0..W-1]
        #   dx=2 tap uses P[2..W+1]   = [img[1..W-1], img[W-2]]
        left = jnp.concatenate([rows[:, 1:2], rows[:, 0:W - 1]], axis=1)
        right = jnp.concatenate([rows[:, 1:W], rows[:, W - 2:W - 1]], axis=1)
        # One lane-axis concat per conv (built once, reused by all 3 dy taps).
        cols = jnp.concatenate([left, rows, right], axis=-1)  # (H+2, W, 3C)

        acc = jnp.dot(cols[0:H].reshape(H * W, 3 * C), w_ref[0],
                      preferred_element_type=jnp.float32)
        for dy in (1, 2):
            acc = acc + jnp.dot(cols[dy:dy + H].reshape(H * W, 3 * C),
                                w_ref[dy],
                                preferred_element_type=jnp.float32)
        return acc                                           # (H*W, C) f32

    def instance_norm(y):
        # y: (H*W, C) f32; biased variance over H*W, no affine; single-pass stats.
        n = float(H * W)
        s = jnp.sum(y, axis=0, keepdims=True)
        ss = jnp.sum(y * y, axis=0, keepdims=True)
        mean = s / n
        var = jnp.maximum(ss / n - mean * mean, 0.0)
        return (y - mean) * jax.lax.rsqrt(var + _EPS)

    x = x_ref[0]                                             # (H, W, C) f32
    y1 = instance_norm(conv3x3(x.astype(jnp.bfloat16), w1_ref))
    y1 = jnp.maximum(y1, 0.0)
    y2 = instance_norm(
        conv3x3(y1.astype(jnp.bfloat16).reshape(H, W, C), w2_ref))
    out_ref[0] = (x + y2.reshape(H, W, C)).astype(out_ref.dtype)


def _resnet_block_pallas(x_nhwc, w1c, w2c):
    N, H, W, C = x_nhwc.shape
    return pl.pallas_call(
        resnet_block_kernel,
        out_shape=jax.ShapeDtypeStruct((N, H, W, C), jnp.float32),
        grid=(N,),
        in_specs=[
            pl.BlockSpec((1, H, W, C), lambda n: (n, 0, 0, 0)),
            pl.BlockSpec((3, 3 * C, C), lambda n: (0, 0, 0)),
            pl.BlockSpec((3, 3 * C, C), lambda n: (0, 0, 0)),
        ],
        out_specs=pl.BlockSpec((1, H, W, C), lambda n: (n, 0, 0, 0)),
        compiler_params=pltpu.CompilerParams(
            dimension_semantics=("parallel",),
            vmem_limit_bytes=64 * 1024 * 1024),
    )(x_nhwc, w1c, w2c)


@jax.jit
def resnet_block_forward(x_nchw, w1, b1, w2, b2):
    """x_nchw: (N, C, H, W) f32.  Weights HWIO (3, 3, C, C); biases (1, C).

    b1/b2 are accepted for interface parity with the PyTorch module
    (use_bias=True) but not applied: InstanceNorm2d(affine=False) subtracts the
    per-channel mean right after the conv, so a constant per-channel bias
    cancels exactly.
    """
    del b1, b2
    x = jnp.transpose(x_nchw, (0, 2, 3, 1))                  # NCHW -> NHWC
    N, H, W, C = x.shape
    # (dy, dx, cin, cout) -> (dy, dx*C + cin, cout), cast to bf16 for the MXU.
    w1c = w1.reshape(3, 3 * C, C).astype(jnp.bfloat16)
    w2c = w2.reshape(3, 3 * C, C).astype(jnp.bfloat16)
    out = _resnet_block_pallas(x, w1c, w2c)
    return jnp.transpose(out, (0, 3, 1, 2))                  # NHWC -> NCHW


# ----------------------------- references ----------------------------------


def _conv_in_reference(y, w, b, cast_bf16):
    yp = jnp.pad(y, ((0, 0), (1, 1), (1, 1), (0, 0)), mode="reflect")
    if cast_bf16:
        yp = yp.astype(jnp.bfloat16)
        w = w.astype(jnp.bfloat16)
    z = jax.lax.conv_general_dilated(
        yp, w, window_strides=(1, 1), padding="VALID",
        dimension_numbers=("NHWC", "HWIO", "NHWC"),
        preferred_element_type=jnp.float32)
    z = z + b.reshape(1, 1, 1, -1)          # bias included (PyTorch use_bias=True)
    mean = jnp.mean(z, axis=(1, 2), keepdims=True)
    var = jnp.mean((z - mean) ** 2, axis=(1, 2), keepdims=True)
    return (z - mean) * jax.lax.rsqrt(var + _EPS)


def _reference_forward(x_nchw, w1, b1, w2, b2, cast_bf16=False):
    """Pure-JAX reference with exact PyTorch semantics (incl. conv biases)."""
    x = jnp.transpose(x_nchw, (0, 2, 3, 1))
    h = jnp.maximum(_conv_in_reference(x, w1, b1, cast_bf16), 0.0)
    out = x + _conv_in_reference(h, w2, b2, cast_bf16)
    return jnp.transpose(out, (0, 3, 1, 2))


if __name__ == "__main__":
    N, C, H, W = 2, 4, 16, 16

    key = jax.random.PRNGKey(0)
    kx, kw1, kb1, kw2, kb2 = jax.random.split(key, 5)

    x = jax.random.normal(kx, (N, C, H, W), dtype=jnp.float32)

    # Deterministic Conv2d-like uniform fan-in init, HWIO layout.
    fan_in = C * 3 * 3
    bound = 1.0 / (fan_in ** 0.5)
    w1 = jax.random.uniform(kw1, (3, 3, C, C), jnp.float32, -bound, bound)
    b1 = jax.random.uniform(kb1, (1, C), jnp.float32, -bound, bound)
    w2 = jax.random.uniform(kw2, (3, 3, C, C), jnp.float32, -bound, bound)
    b2 = jax.random.uniform(kb2, (1, C), jnp.float32, -bound, bound)

    out = jax.block_until_ready(resnet_block_forward(x, w1, b1, w2, b2))
    assert out.shape == (N, C, H, W)

    # 1) Tight check vs. a reference matching the kernel's precision
    #    (bf16 matmul operands, f32 accumulation / statistics).
    ref_bf16 = _reference_forward(x, w1, b1, w2, b2, cast_bf16=True)
    assert jnp.allclose(out, ref_bf16, atol=2e-2, rtol=2e-2), \
        "mismatch vs bf16-matched reference"

    # 2) Loose check vs. the full-f32 reference (bounds bf16 quantization error).
    ref_f32 = _reference_forward(x, w1, b1, w2, b2, cast_bf16=False)
    assert jnp.allclose(out, ref_f32, atol=1e-1, rtol=1e-1), \
        "mismatch vs f32 reference"

    print("KERNEL_OK")
</pallas_src>

<mosaic_0001>
module attributes {stable_mosaic.version = 11 : i64} {
  func.func @resnet_block_kernel(%arg0: i32, %arg1: memref<1x16x16x4xf32, #tpu.memory_space<vmem>>, %arg2: memref<3x12x4xbf16, #tpu.memory_space<vmem>>, %arg3: memref<3x12x4xbf16, #tpu.memory_space<vmem>>, %arg4: memref<1x16x16x4xf32, #tpu.memory_space<vmem>>) attributes {dimension_semantics = [#tpu.dimension_semantics<parallel>], iteration_bounds = array<i64: 2>, scalar_prefetch = 0 : i64, scratch_operands = 0 : i64, tpu.core_type = #tpu.core_type<tc>, window_params = [{transform_indices = @transform_0, window_bounds = array<i64: 1, 16, 16, 4>}, {pipeline_mode = #tpu.pipeline_mode<synchronous>, transform_indices = @transform_1, window_bounds = array<i64: 3, 12, 4>}, {pipeline_mode = #tpu.pipeline_mode<synchronous>, transform_indices = @transform_2, window_bounds = array<i64: 3, 12, 4>}, {transform_indices = @transform_3, window_bounds = array<i64: 1, 16, 16, 4>}]} {
    %c0 = arith.constant 0 : index
    %c0_0 = arith.constant 0 : index
    %c0_1 = arith.constant 0 : index
    %c0_2 = arith.constant 0 : index
    %0 = vector.load %arg1[%c0, %c0_0, %c0_1, %c0_2] : memref<1x16x16x4xf32, #tpu.memory_space<vmem>>, vector<1x16x16x4xf32>
    %1 = vector.shape_cast %0 : vector<1x16x16x4xf32> to vector<16x16x4xf32>
    %2 = arith.truncf %1 : vector<16x16x4xf32> to vector<16x16x4xbf16>
    %3 = vector.extract_strided_slice %2 {offsets = [1, 0, 0], sizes = [1, 16, 4], strides = [1, 1, 1]} : vector<16x16x4xbf16> to vector<1x16x4xbf16>
    %4 = vector.extract_strided_slice %2 {offsets = [14, 0, 0], sizes = [1, 16, 4], strides = [1, 1, 1]} : vector<16x16x4xbf16> to vector<1x16x4xbf16>
    %5 = tpu.concatenate %3, %2, %4 in 0 : vector<1x16x4xbf16>, vector<16x16x4xbf16>, vector<1x16x4xbf16> -> vector<18x16x4xbf16>
    %6 = vector.extract_strided_slice %5 {offsets = [0, 1, 0], sizes = [18, 1, 4], strides = [1, 1, 1]} : vector<18x16x4xbf16> to vector<18x1x4xbf16>
    %7 = vector.extract_strided_slice %5 {offsets = [0, 0, 0], sizes = [18, 15, 4], strides = [1, 1, 1]} : vector<18x16x4xbf16> to vector<18x15x4xbf16>
    %8 = tpu.concatenate %6, %7 in 1 : vector<18x1x4xbf16>, vector<18x15x4xbf16> -> vector<18x16x4xbf16>
    %9 = vector.extract_strided_slice %5 {offsets = [0, 1, 0], sizes = [18, 15, 4], strides = [1, 1, 1]} : vector<18x16x4xbf16> to vector<18x15x4xbf16>
    %10 = vector.extract_strided_slice %5 {offsets = [0, 14, 0], sizes = [18, 1, 4], strides = [1, 1, 1]} : vector<18x16x4xbf16> to vector<18x1x4xbf16>
    %11 = tpu.concatenate %9, %10 in 1 : vector<18x15x4xbf16>, vector<18x1x4xbf16> -> vector<18x16x4xbf16>
    %12 = tpu.concatenate %8, %5, %11 in 2 : vector<18x16x4xbf16>, vector<18x16x4xbf16>, vector<18x16x4xbf16> -> vector<18x16x12xbf16>
    %13 = vector.extract_strided_slice %12 {offsets = [0, 0, 0], sizes = [16, 16, 12], strides = [1, 1, 1]} : vector<18x16x12xbf16> to vector<16x16x12xbf16>
    %14 = vector.shape_cast %13 : vector<16x16x12xbf16> to vector<256x12xbf16>
    %c0_3 = arith.constant 0 : index
    %c0_4 = arith.constant 0 : index
    %c0_5 = arith.constant 0 : index
    %15 = vector.load %arg2[%c0_3, %c0_4, %c0_5] : memref<3x12x4xbf16, #tpu.memory_space<vmem>>, vector<1x12x4xbf16>
    %16 = vector.shape_cast %15 : vector<1x12x4xbf16> to vector<12x4xbf16>
    %cst = arith.constant dense<0.000000e+00> : vector<256x4xf32>
    %17 = tpu.matmul %14, %16, %cst {dimension_numbers = #tpu.dot_dimension_numbers<[1], [0], [0], [1], [0, 0, 1, 1], [], []>} : vector<256x12xbf16>, vector<12x4xbf16>, vector<256x4xf32> -> vector<256x4xf32>
    %18 = vector.extract_strided_slice %12 {offsets = [1, 0, 0], sizes = [16, 16, 12], strides = [1, 1, 1]} : vector<18x16x12xbf16> to vector<16x16x12xbf16>
    %19 = vector.shape_cast %18 : vector<16x16x12xbf16> to vector<256x12xbf16>
    %c1 = arith.constant 1 : index
    %c0_6 = arith.constant 0 : index
    %c0_7 = arith.constant 0 : index
    %20 = vector.load %arg2[%c1, %c0_6, %c0_7] : memref<3x12x4xbf16, #tpu.memory_space<vmem>>, vector<1x12x4xbf16>
    %21 = vector.shape_cast %20 : vector<1x12x4xbf16> to vector<12x4xbf16>
    %cst_8 = arith.constant dense<0.000000e+00> : vector<256x4xf32>
    %22 = tpu.matmul %19, %21, %cst_8 {dimension_numbers = #tpu.dot_dimension_numbers<[1], [0], [0], [1], [0, 0, 1, 1], [], []>} : vector<256x12xbf16>, vector<12x4xbf16>, vector<256x4xf32> -> vector<256x4xf32>
    %23 = arith.addf %17, %22 : vector<256x4xf32>
    %24 = vector.extract_strided_slice %12 {offsets = [2, 0, 0], sizes = [16, 16, 12], strides = [1, 1, 1]} : vector<18x16x12xbf16> to vector<16x16x12xbf16>
    %25 = vector.shape_cast %24 : vector<16x16x12xbf16> to vector<256x12xbf16>
    %c2 = arith.constant 2 : index
    %c0_9 = arith.constant 0 : index
    %c0_10 = arith.constant 0 : index
    %26 = vector.load %arg2[%c2, %c0_9, %c0_10] : memref<3x12x4xbf16, #tpu.memory_space<vmem>>, vector<1x12x4xbf16>
    %27 = vector.shape_cast %26 : vector<1x12x4xbf16> to vector<12x4xbf16>
    %cst_11 = arith.constant dense<0.000000e+00> : vector<256x4xf32>
    %28 = tpu.matmul %25, %27, %cst_11 {dimension_numbers = #tpu.dot_dimension_numbers<[1], [0], [0], [1], [0, 0, 1, 1], [], []>} : vector<256x12xbf16>, vector<12x4xbf16>, vector<256x4xf32> -> vector<256x4xf32>
    %29 = arith.addf %23, %28 : vector<256x4xf32>
    %cst_12 = arith.constant dense<0.000000e+00> : vector<4xf32>
    %30 = vector.multi_reduction <add>, %29, %cst_12 [0] : vector<256x4xf32> to vector<4xf32>
    %31 = vector.shape_cast %30 : vector<4xf32> to vector<1x4xf32>
    %32 = arith.mulf %29, %29 : vector<256x4xf32>
    %cst_13 = arith.constant dense<0.000000e+00> : vector<4xf32>
    %33 = vector.multi_reduction <add>, %32, %cst_13 [0] : vector<256x4xf32> to vector<4xf32>
    %34 = vector.shape_cast %33 : vector<4xf32> to vector<1x4xf32>
    %cst_14 = arith.constant 2.560000e+02 : f32
    %35 = vector.broadcast %cst_14 : f32 to vector<1x4xf32>
    %36 = arith.divf %31, %35 : vector<1x4xf32>
    %cst_15 = arith.constant 2.560000e+02 : f32
    %37 = vector.broadcast %cst_15 : f32 to vector<1x4xf32>
    %38 = arith.divf %34, %37 : vector<1x4xf32>
    %39 = arith.mulf %36, %36 : vector<1x4xf32>
    %40 = arith.subf %38, %39 : vector<1x4xf32>
    %cst_16 = arith.constant 0.000000e+00 : f32
    %41 = vector.broadcast %cst_16 : f32 to vector<1x4xf32>
    %42 = arith.maximumf %40, %41 : vector<1x4xf32>
    %43 = vector.broadcast %36 : vector<1x4xf32> to vector<256x4xf32>
    %44 = arith.subf %29, %43 : vector<256x4xf32>
    %cst_17 = arith.constant 9.99999974E-6 : f32
    %45 = vector.broadcast %cst_17 : f32 to vector<1x4xf32>
    %46 = arith.addf %42, %45 : vector<1x4xf32>
    %47 = math.rsqrt %46 : vector<1x4xf32>
    %48 = vector.broadcast %47 : vector<1x4xf32> to vector<256x4xf32>
    %49 = arith.mulf %44, %48 : vector<256x4xf32>
    %cst_18 = arith.constant 0.000000e+00 : f32
    %50 = vector.broadcast %cst_18 : f32 to vector<256x4xf32>
    %51 = arith.maximumf %49, %50 : vector<256x4xf32>
    %52 = arith.truncf %51 : vector<256x4xf32> to vector<256x4xbf16>
    %53 = vector.shape_cast %52 : vector<256x4xbf16> to vector<16x16x4xbf16>
    %54 = vector.extract_strided_slice %53 {offsets = [1, 0, 0], sizes = [1, 16, 4], strides = [1, 1, 1]} : vector<16x16x4xbf16> to vector<1x16x4xbf16>
    %55 = vector.extract_strided_slice %53 {offsets = [14, 0, 0], sizes = [1, 16, 4], strides = [1, 1, 1]} : vector<16x16x4xbf16> to vector<1x16x4xbf16>
    %56 = tpu.concatenate %54, %53, %55 in 0 : vector<1x16x4xbf16>, vector<16x16x4xbf16>, vector<1x16x4xbf16> -> vector<18x16x4xbf16>
    %57 = vector.extract_strided_slice %56 {offsets = [0, 1, 0], sizes = [18, 1, 4], strides = [1, 1, 1]} : vector<18x16x4xbf16> to vector<18x1x4xbf16>
    %58 = vector.extract_strided_slice %56 {offsets = [0, 0, 0], sizes = [18, 15, 4], strides = [1, 1, 1]} : vector<18x16x4xbf16> to vector<18x15x4xbf16>
    %59 = tpu.concatenate %57, %58 in 1 : vector<18x1x4xbf16>, vector<18x15x4xbf16> -> vector<18x16x4xbf16>
    %60 = vector.extract_strided_slice %56 {offsets = [0, 1, 0], sizes = [18, 15, 4], strides = [1, 1, 1]} : vector<18x16x4xbf16> to vector<18x15x4xbf16>
    %61 = vector.extract_strided_slice %56 {offsets = [0, 14, 0], sizes = [18, 1, 4], strides = [1, 1, 1]} : vector<18x16x4xbf16> to vector<18x1x4xbf16>
    %62 = tpu.concatenate %60, %61 in 1 : vector<18x15x4xbf16>, vector<18x1x4xbf16> -> vector<18x16x4xbf16>
    %63 = tpu.concatenate %59, %56, %62 in 2 : vector<18x16x4xbf16>, vector<18x16x4xbf16>, vector<18x16x4xbf16> -> vector<18x16x12xbf16>
    %64 = vector.extract_strided_slice %63 {offsets = [0, 0, 0], sizes = [16, 16, 12], strides = [1, 1, 1]} : vector<18x16x12xbf16> to vector<16x16x12xbf16>
    %65 = vector.shape_cast %64 : vector<16x16x12xbf16> to vector<256x12xbf16>
    %c0_19 = arith.constant 0 : index
    %c0_20 = arith.constant 0 : index
    %c0_21 = arith.constant 0 : index
    %66 = vector.load %arg3[%c0_19, %c0_20, %c0_21] : memref<3x12x4xbf16, #tpu.memory_space<vmem>>, vector<1x12x4xbf16>
    %67 = vector.shape_cast %66 : vector<1x12x4xbf16> to vector<12x4xbf16>
    %cst_22 = arith.constant dense<0.000000e+00> : vector<256x4xf32>
    %68 = tpu.matmul %65, %67, %cst_22 {dimension_numbers = #tpu.dot_dimension_numbers<[1], [0], [0], [1], [0, 0, 1, 1], [], []>} : vector<256x12xbf16>, vector<12x4xbf16>, vector<256x4xf32> -> vector<256x4xf32>
    %69 = vector.extract_strided_slice %63 {offsets = [1, 0, 0], sizes = [16, 16, 12], strides = [1, 1, 1]} : vector<18x16x12xbf16> to vector<16x16x12xbf16>
    %70 = vector.shape_cast %69 : vector<16x16x12xbf16> to vector<256x12xbf16>
    %c1_23 = arith.constant 1 : index
    %c0_24 = arith.constant 0 : index
    %c0_25 = arith.constant 0 : index
    %71 = vector.load %arg3[%c1_23, %c0_24, %c0_25] : memref<3x12x4xbf16, #tpu.memory_space<vmem>>, vector<1x12x4xbf16>
    %72 = vector.shape_cast %71 : vector<1x12x4xbf16> to vector<12x4xbf16>
    %cst_26 = arith.constant dense<0.000000e+00> : vector<256x4xf32>
    %73 = tpu.matmul %70, %72, %cst_26 {dimension_numbers = #tpu.dot_dimension_numbers<[1], [0], [0], [1], [0, 0, 1, 1], [], []>} : vector<256x12xbf16>, vector<12x4xbf16>, vector<256x4xf32> -> vector<256x4xf32>
    %74 = arith.addf %68, %73 : vector<256x4xf32>
    %75 = vector.extract_strided_slice %63 {offsets = [2, 0, 0], sizes = [16, 16, 12], strides = [1, 1, 1]} : vector<18x16x12xbf16> to vector<16x16x12xbf16>
    %76 = vector.shape_cast %75 : vector<16x16x12xbf16> to vector<256x12xbf16>
    %c2_27 = arith.constant 2 : index
    %c0_28 = arith.constant 0 : index
    %c0_29 = arith.constant 0 : index
    %77 = vector.load %arg3[%c2_27, %c0_28, %c0_29] : memref<3x12x4xbf16, #tpu.memory_space<vmem>>, vector<1x12x4xbf16>
    %78 = vector.shape_cast %77 : vector<1x12x4xbf16> to vector<12x4xbf16>
    %cst_30 = arith.constant dense<0.000000e+00> : vector<256x4xf32>
    %79 = tpu.matmul %76, %78, %cst_30 {dimension_numbers = #tpu.dot_dimension_numbers<[1], [0], [0], [1], [0, 0, 1, 1], [], []>} : vector<256x12xbf16>, vector<12x4xbf16>, vector<256x4xf32> -> vector<256x4xf32>
    %80 = arith.addf %74, %79 : vector<256x4xf32>
    %cst_31 = arith.constant dense<0.000000e+00> : vector<4xf32>
    %81 = vector.multi_reduction <add>, %80, %cst_31 [0] : vector<256x4xf32> to vector<4xf32>
    %82 = vector.shape_cast %81 : vector<4xf32> to vector<1x4xf32>
    %83 = arith.mulf %80, %80 : vector<256x4xf32>
    %cst_32 = arith.constant dense<0.000000e+00> : vector<4xf32>
    %84 = vector.multi_reduction <add>, %83, %cst_32 [0] : vector<256x4xf32> to vector<4xf32>
    %85 = vector.shape_cast %84 : vector<4xf32> to vector<1x4xf32>
    %cst_33 = arith.constant 2.560000e+02 : f32
    %86 = vector.broadcast %cst_33 : f32 to vector<1x4xf32>
    %87 = arith.divf %82, %86 : vector<1x4xf32>
    %cst_34 = arith.constant 2.560000e+02 : f32
    %88 = vector.broadcast %cst_34 : f32 to vector<1x4xf32>
    %89 = arith.divf %85, %88 : vector<1x4xf32>
    %90 = arith.mulf %87, %87 : vector<1x4xf32>
    %91 = arith.subf %89, %90 : vector<1x4xf32>
    %cst_35 = arith.constant 0.000000e+00 : f32
    %92 = vector.broadcast %cst_35 : f32 to vector<1x4xf32>
    %93 = arith.maximumf %91, %92 : vector<1x4xf32>
    %94 = vector.broadcast %87 : vector<1x4xf32> to vector<256x4xf32>
    %95 = arith.subf %80, %94 : vector<256x4xf32>
    %cst_36 = arith.constant 9.99999974E-6 : f32
    %96 = vector.broadcast %cst_36 : f32 to vector<1x4xf32>
    %97 = arith.addf %93, %96 : vector<1x4xf32>
    %98 = math.rsqrt %97 : vector<1x4xf32>
    %99 = vector.broadcast %98 : vector<1x4xf32> to vector<256x4xf32>
    %100 = arith.mulf %95, %99 : vector<256x4xf32>
    %101 = vector.shape_cast %100 : vector<256x4xf32> to vector<16x16x4xf32>
    %102 = arith.addf %1, %101 : vector<16x16x4xf32>
    %c0_37 = arith.constant 0 : index
    %c0_38 = arith.constant 0 : index
    %c0_39 = arith.constant 0 : index
    %c0_40 = arith.constant 0 : index
    %103 = vector.load %arg4[%c0_37, %c0_38, %c0_39, %c0_40] : memref<1x16x16x4xf32, #tpu.memory_space<vmem>>, vector<1x16x16x4xf32>
    %104 = vector.shape_cast %103 : vector<1x16x16x4xf32> to vector<16x16x4xf32>
    %105 = vector.shape_cast %102 : vector<16x16x4xf32> to vector<1x16x16x4xf32>
    tpu.vector_store %arg4[%c0_37, %c0_38, %c0_39, %c0_40], %105 {strides = array<i32>} : memref<1x16x16x4xf32, #tpu.memory_space<vmem>>, vector<1x16x16x4xf32>,
    return
  }
  func.func @transform_0(%arg0: i32) -> (i32, i32, i32, i32) {
    %c0_i32 = arith.constant 0 : i32
    %c0_i32_0 = arith.constant 0 : i32
    %c0_i32_1 = arith.constant 0 : i32
    %c0_i32_2 = arith.constant 0 : i32
    return %arg0, %c0_i32, %c0_i32_0, %c0_i32_1 : i32, i32, i32, i32
  }
  func.func @transform_1(%arg0: i32) -> (i32, i32, i32) {
    %c0_i32 = arith.constant 0 : i32
    %c0_i32_0 = arith.constant 0 : i32
    %c0_i32_1 = arith.constant 0 : i32
    %c0_i32_2 = arith.constant 0 : i32
    return %c0_i32, %c0_i32_0, %c0_i32_1 : i32, i32, i32
  }
  func.func @transform_2(%arg0: i32) -> (i32, i32, i32) {
    %c0_i32 = arith.constant 0 : i32
    %c0_i32_0 = arith.constant 0 : i32
    %c0_i32_1 = arith.constant 0 : i32
    %c0_i32_2 = arith.constant 0 : i32
    return %c0_i32, %c0_i32_0, %c0_i32_1 : i32, i32, i32
  }
  func.func @transform_3(%arg0: i32) -> (i32, i32, i32, i32) {
    %c0_i32 = arith.constant 0 : i32
    %c0_i32_0 = arith.constant 0 : i32
    %c0_i32_1 = arith.constant 0 : i32
    %c0_i32_2 = arith.constant 0 : i32
    return %arg0, %c0_i32, %c0_i32_0, %c0_i32_1 : i32, i32, i32, i32
  }
}

</mosaic_0001>

<bundles_post_ra>
// kernel: resnet_block_forward.1
= control target key start
LH: loop header
LB: loop body
LE: loop exit
PB: predicated region body
PF: predicated region fallthrough
CT: control target
= control target key end

     0   :  { %8 = vsyncpa [#allocation3], 0  ;;  %s6007_s0 = inlined_call_operand.hbm [shape: f32[2,16,16,4], index: 0, kind: input, shape index: {}]   ;;  %s6008_s1 = inlined_call_operand.hbm [shape: bf16[3,12,4], index: 1, kind: input, shape index: {}]   ;;  %s6009_s2 = inlined_call_operand.hbm [shape: bf16[3,12,4], index: 2, kind: input, shape index: {}]   ;;  %s6010_s3 = inlined_call_operand.hbm [shape: f32[2,16,16,4], index: 3, kind: output, shape index: {}]  }
   0x1   :  { %10 = vsyncpa [#allocation3 + $0x1], 0 }
   0x2   :  { %11 = vsyncpa [#allocation6], 0 }
   0x3   :  { %12 = vsyncpa [#allocation4], 0 }
   0x4   :  { %14 = vsyncpa [#allocation4 + $0x1], 0  ;;  %s3835_s12 = smov 0   ;;  %s3837_s13 = smov 0  }
   0x5   :  { %s3839_s14 = smov 0   ;;  %s3841_s15 = smov 0  }
   0x6 LB: > { %s3856_s16 = sadd.s32 4294967295, %s3802_s15   ;;  %s2968_s17 = sadd.s32 4294967294, %s3802_s15   ;;  %s3802_s15 = sphi %s3841_s15, %s6044_s15   ;;  %s3798_s14 = sphi %s3839_s14, %s6043_s14   ;;  %s3794_s13 = sphi %s3837_s13, %s6042_s13   ;;  %s3790_s12 = sphi %s3835_s12, %s6041_s12  }
   0x7   : > { %p40_p0 = scmp.ne.s32.totalorder %s3794_s13, %s3790_s12  ;;  %p6011_p1 = scmp.eq.s32.totalorder %s3856_s16, 0 }
   0x8   : > { %p112_p3 = scmp.eq.s32.totalorder %s2968_s17, 1  ;;  %p2969_p5 = scmp.ge.s32.totalorder %s3802_s15, 1 }
   0x9   : > { %p3865_p4 = por %p6011_p1, %p40_p0  ;;  %p119_p7 = scmp.lt.s32.totalorder %s3802_s15, 3 }
   0xa   : > { %p3870_p6 = por %p112_p3, %p40_p0  ;;  %s3804_s21 = smov [#allocation5]  }
   0xb   : > { %s6014_s18 = scalar_select %p3865_p4, 1, 0 }
   0xc   : > { %s6015_s19 = scalar_select %p3870_p6, 1, 0 }
   0xd   : > { %p3875_p8 = pnand %p2969_p5, %p119_p7  ;;  %s131_s22 = sshll.u32 %s3804_s21, 4  ;;  %s3879_s22 = int_to_ptr.vmem [resolvable:$true] %s131_s22 }
   0xe   : > { %s3805_s24 = smov [#allocation7]   ;;  %s3646_s28 = scalar_lea.hbm %s6008_s1, 384 }
   0xf   : > { %p3542_p9 = pneg %p3875_p8  ;;  %s144_s25 = sshll.u32 %s3805_s24, 4  ;;  %s3890_s25 = int_to_ptr.vmem [resolvable:$true] %s144_s25 }
  0x10   : > { %p3647_p12 = scmp.ne.s32.totalorder %s6008_s1, %s3646_s28  ;;  %p3653_p5 = scmp.lt.u32.totalorder %s3646_s28, %s6008_s1 }
  0x11   : > { %p3886_p11 = pnand %p3542_p9, %p6011_p1 }
  0x13   : > { %p3648_p13 = pneg %p3886_p11 }
  0x15   : > { %p3649_p0 = pnand %p3648_p13, %p3647_p12 }
  0x17   : > { %p3650_p3 = pneg %p3649_p0 }
  0x19   : > { %p3655_p7 = pnand %p3653_p5, %p3650_p3 }
  0x1b   : > { %3658 = shalt.err (!%p3655_p7)
}
  0x1c   : > { %s3659_s6 = scalar_lea.vmem %s3879_s22, 384  ;;  %p3667_p2 = scmp.lt.s32.totalorder %s3879_s22, %s3879_s22 }
  0x1d   : > { %p3660_p9 = scmp.ne.s32.totalorder %s3879_s22, %s3659_s6  ;;  %p3668_p12 = scmp.lt.s32.totalorder %s3659_s6, %s3659_s6 }
  0x1f   : > { %p3662_p10 = pnand %p3660_p9, %p3648_p13  ;;  %p3669_p0 = por %p3668_p12, %p3667_p2 }
  0x21   : > { %p3663_p1 = pneg %p3662_p10 }
  0x23   : > { %p3670_p6 = pnand %p3669_p0, %p3663_p1 }
  0x25   : > { %3673 = shalt.err (!%p3670_p6)
}
  0x26   : > { %s3806_s7 = smov 64   ;;  %s3807_s8 = smov 4  }
  0x27   : > { %3545 = dma.hbm_to_vmem [thread:$0]  (!%p3886_p11), %s6008_s1, 384, %s3879_s22, [#allocation6], %s3806_s7, %s3806_s7, %s3807_s8  }
  0x28   : > { %s3674_s21 = scalar_lea.hbm %s6009_s2, 384 }
  0x29   : > { %p3675_p2 = scmp.ne.s32.totalorder %s6009_s2, %s3674_s21  ;;  %p3681_p10 = scmp.lt.u32.totalorder %s3674_s21, %s6009_s2 }
  0x2b   : > { %p3677_p1 = pnand %p3675_p2, %p3648_p13 }
  0x2d   : > { %p3678_p6 = pneg %p3677_p1 }
  0x2f   : > { %p3683_p3 = pnand %p3681_p10, %p3678_p6 }
  0x31   : > { %3686 = shalt.err (!%p3683_p3)
}
  0x32   : > { %s3687_s22 = scalar_lea.vmem %s3890_s25, 384  ;;  %p3695_p12 = scmp.lt.s32.totalorder %s3890_s25, %s3890_s25 }
  0x33   : > { %p3688_p5 = scmp.ne.s32.totalorder %s3890_s25, %s3687_s22  ;;  %p3696_p0 = scmp.lt.s32.totalorder %s3687_s22, %s3687_s22 }
  0x35   : > { %p3690_p7 = pnand %p3688_p5, %p3648_p13  ;;  %p3697_p2 = por %p3696_p0, %p3695_p12 }
  0x37   : > { %p3691_p9 = pneg %p3690_p7 }
  0x39   : > { %p3698_p1 = pnand %p3697_p2, %p3691_p9 }
  0x3b   : > { %3701 = shalt.err (!%p3698_p1)
}
  0x3c   : > { %3548 = dma.hbm_to_vmem [thread:$0]  (!%p3886_p11), %s6009_s2, 384, %s3890_s25, [#allocation6], %s3806_s7, %s3806_s7, %s3807_s8  }
  0x3d   : > { %s3945_s4 = sadd.s32 1, %s3802_s15   ;;  %s27_s23 = sadd.s32 1, %s3798_s14 }
  0x3e   : > { %s24_s5 = ssub.s32 %s3802_s15, %s3945_s4  ;;  %p34_p13 = scmp.ne.s32.totalorder %s3798_s14, %s3794_s13 }
  0x3f   : > { %p25_p6 = scmp.eq.s32.totalorder %s24_s5, 0  ;;  %p35_p10 = scmp.eq.s32.totalorder %s3802_s15, 0 }
  0x40   : > { %p6018_p3 = scmp.eq.s32.totalorder %s3856_s16, 1  ;;  %p3559_p7 = scmp.lt.s32.totalorder %s3802_s15, 2 }
  0x41   : > { %s3961_s9 = scalar_select %p25_p6, %s3798_s14, %s27_s23  }
  0x42   : > { %p3955_p5 = por %p6018_p3, %p34_p13  ;;  %p36_p9 = por %p35_p10, %p34_p13 }
  0x43   : > { %s158_s10 = sand.u32 1, %s3798_s14   ;;  %s3088_s25 = sshll.u32 %s3802_s15, 12 }
  0x44   : > { %s6019_s6 = scalar_select %p3955_p5, 1, 0 }
  0x45   : > { %s2973_s11 = sshll.u32 %s158_s10, 8  ;;  %s3968_s17 = scalar_lea.hbm %s6007_s0, %s3088_s25 }
  0x46   : > { %s162_s21 = scalar_lea.vmem [#allocation2], %s2973_s11  ;;  %p3972_p11 = pnand %p3559_p7, %p36_p9 }
  0x47   : > { %s169_s24 = sshll.u32 %s162_s21, 4  ;;  %s3976_s27 = scalar_lea.sflag [#allocation3], %s158_s10  ;;  %s3970_s24 = int_to_ptr.vmem [resolvable:$true] %s169_s24 }
  0x48   : > { %s3702_s28 = scalar_lea.hbm %s3968_s17, 4096  ;;  %p3704_p0 = pneg %p3972_p11 }
  0x49   : > { %p3703_p12 = scmp.ne.s32.totalorder %s3968_s17, %s3702_s28  ;;  %s3707_s30 = scalar_lea.hbm %s6007_s0, 8192 }
  0x4a   : > { %p3708_p13 = scmp.lt.u32.totalorder %s3968_s17, %s6007_s0  ;;  %p3709_p6 = scmp.lt.u32.totalorder %s3707_s30, %s3702_s28 }
  0x4b   : > { %p3705_p2 = pnand %p3704_p0, %p3703_p12  ;;  %p3711_p3 = scmp.lt.u32.totalorder %s3702_s28, %s3968_s17 }
  0x4c   : > { %p3710_p10 = por %p3709_p6, %p3708_p13 }
  0x4d   : > { %p3706_p1 = pneg %p3705_p2 }
  0x4e   : > { %p3712_p7 = por %p3711_p3, %p3710_p10 }
  0x50   : > { %p3713_p9 = pnand %p3712_p7, %p3706_p1 }
  0x52   : > { %3716 = shalt.err (!%p3713_p9)
}
  0x53   : > { %s3717_s10 = scalar_lea.vmem %s3970_s24, 4096  ;;  %s3808_s11 = smov [#allocation2]  }
  0x54   : > { %p3718_p12 = scmp.ne.s32.totalorder %s3970_s24, %s3717_s10  ;;  %s3722_s25 = sshll.u32 %s3808_s11, 4  ;;  %s3723_s25 = int_to_ptr.vmem [resolvable:$false] %s3722_s25 }
  0x55   : > { %s3724_s7 = scalar_lea.vmem %s3723_s25, 8192  ;;  %p3725_p4 = scmp.lt.s32.totalorder %s3970_s24, %s3723_s25 }
  0x56   : > { %p3720_p2 = pnand %p3718_p12, %p3704_p0  ;;  %p3726_p13 = scmp.lt.s32.totalorder %s3724_s7, %s3717_s10 }
  0x58   : > { %p3721_p5 = pneg %p3720_p2  ;;  %p3727_p6 = por %p3726_p13, %p3725_p4 }
  0x5a   : > { %p3728_p10 = pnand %p3727_p6, %p3721_p5 }
  0x5c   : > { %3731 = shalt.err (!%p3728_p10)
}
  0x5d   : > { %s3809_s8 = smov 128   ;;  %s3810_s21 = smov 8  }
  0x5e   : > { %3552 = dma.hbm_to_vmem [thread:$0]  (!%p3972_p11), %s3968_s17, 4096, %s3970_s24, %s3976_s27, %s3809_s8, %s3809_s8, %s3810_s21  }
  0x5f   : > { %181 = sbr.rel (%p3875_p8) target bundleno = 1291 (0x50b), region = 32  ;;  %s4007_s28 = sand.u32 (!%p3875_p8), 1, %s3794_s13  }
  0x60   : > { %s2977_s22 = sshll.u32 (!%p3875_p8), %s4007_s28, 8  ;;  %s184_s29 = scalar_lea.sflag (!%p3875_p8), [#allocation3], %s4007_s28 }
  0x61   : > { %s4013_s30 = scalar_lea.vmem (!%p3875_p8), [#allocation2], %s2977_s22  ;;  %p6021_p4 = scmp.ne.s32.totalorder (!%p3875_p8), %s6014_s18, 0 }
  0x66   : > { %3777 = dma.done.wait (%p6021_p4), %s184_s29, 4096  }
  0x67   : > { %3779 = vsyncadd (%p6021_p4), %s184_s29, 4294963200  ;;  %p6022_p5 = scmp.eq.s32.totalorder %s3856_s16, 0 }
  0x69   : > { %3781 = dma.done.wait (%p6022_p5), [#allocation6], 768   ;;  %p6023_p8 = pmov %p6022_p5 }
  0x6a   : > { %v219_v0 = vld [vmem:[%s4013_s30] sm:$0xff]  ;;  %v220_v1 = vld [vmem:[%s4013_s30 + $0x8] sm:$0xff]  ;;  %v221_v2 = vld [vmem:[%s4013_s30 + $0x10] sm:$0xff]  ;;  %vm494_vm0 = vcmask 1047552   ;;  %s3811_s18 = smov 4   ;;  %s3812_s20 = smov 8  }
  0x6b   : > { %3783 = vsyncadd (%p6023_p8), [#allocation6], 4294966528  ;;  %v251_v3 = vpack.c.bf16 %v220_v1, %v219_v0  ;;  %v222_v4 = vld [vmem:[%s4013_s30 + $0x18] sm:$0xff]  ;;  %v223_v5 = vld [vmem:[%s4013_s30 + $0x20] sm:$0xff]  ;;  %vm495_vm1 = vsmask.f32 7424 }
  0x6c   : > { %v224_v6 = vld [vmem:[%s4013_s30 + $0x28] sm:$0xff]  ;;  %v252_v7 = vpack.c.bf16 %v222_v4, %v221_v2  ;;  %v225_v9 = vld [vmem:[%s4013_s30 + $0x30] sm:$0xff]  ;;  %v226_v10 = vld [vmem:[%s4013_s30 + $0x38] sm:$0xff]  ;;  %vm734_vm3 = vcmask 1045504   ;;  %vm411_vm4 = vcmask 1040384   ;;  %vm609_vm7 = vcmask 31744  }
  0x6d   : > { %v253_v8 = vpack.c.bf16 %v224_v6, %v223_v5  ;;  %v227_v11 = vld [vmem:[%s4013_s30 + $0x40] sm:$0xff]  ;;  %531 = vrot.lane.b32.xlu0 %v251_v3, %s3811_s18  ;;  %v4033_v12 = vshrl.u32 %v251_v3, 16  ;;  %v4035_v13 = vshll.u32 %v251_v3, 16  ;;  %v254_v14 = vpack.c.bf16 %v226_v10, %v225_v9  ;;  %v228_v15 = vld [vmem:[%s4013_s30 + $0x48] sm:$0xff]  ;;  %v229_v22 = vld [vmem:[%s4013_s30 + $0x50] sm:$0xff]  ;;  %s5818_s17 = scalar_lea.vmem [#allocation8], %s2977_s22 }
  0x6e   : > { %v4038_v16 = vshrl.u32 %v252_v7, 16  ;;  %v4042_v18 = vshll.u32 %v252_v7, 16  ;;  %v255_v21 = vpack.c.bf16 %v228_v15, %v227_v11  ;;  %v230_v23 = vld [vmem:[%s4013_s30 + $0x58] sm:$0xff]  ;;  %vm4050_vm2 = vmand %vm494_vm0, %vm495_vm1  ;;  %v231_v27 = vld [vmem:[%s4013_s30 + $0x60] sm:$0xff]  ;;  %vm412_vm5 = vsmask.f32 256 }
  0x6f   : > { %v4040_v17 = vshrl.u32 %v253_v8, 16  ;;  %v4044_v19 = vshll.u32 %v253_v8, 16  ;;  %v432_v20 = vrot.slane %v4035_v13, 1  ;;  %v232_v28 = vld [vmem:[%s4013_s30 + $0x68] sm:$0xff]  ;;  %v4060_v30 = vshll.u32 %v254_v14, 16  ;;  %v233_v38 = vld [vmem:[%s4013_s30 + $0x70] sm:$0xff]  ;;  %vm4178_vm6 = vmand %vm411_vm4, %vm412_vm5 }
  0x70   : > { %v430_v25 = vrot.slane %v4042_v18, 1  ;;  %v4064_v33 = vshll.u32 %v255_v21, 16  ;;  %v4066_v34 = vpack.c.bf16 %v230_v23, %v229_v22  ;;  %v4071_v36 = vpack.c.bf16 %v232_v28, %v231_v27  ;;  %v234_v39 = vld [vmem:[%s4013_s30 + $0x78] sm:$0xff]  ;;  %v235_v42 = vld [vmem:[%s4013_s30 + $0x80] sm:$0xff]  ;;  %v236_v47 = vld [vmem:[%s4013_s30 + $0x88] sm:$0xff]  ;;  %s3089_s24 = sshll.u32 %s3856_s16, 12 }
  0x71   : > { %v434_v26 = vrot.slane %v4044_v19, 1  ;;  %529 = vrot.lane.b32.xlu0 %v252_v7, %s3811_s18  ;;  %v433_v29 = vor.u32 %v432_v20, %v4033_v12  ;;  %v4074_v37 = vshrl.u32 %v254_v14, 16  ;;  %v436_v41 = vrot.slane %v4060_v30, 1  ;;  %v3604_v48 = vld [vmem:[#allocation5 + $0x8] sm:$0x3f]   ;;  %v237_v51 = vld [vmem:[%s4013_s30 + $0x90] sm:$0xff]  ;;  %s5926_s5 = scalar_lea.hbm %s6010_s3, %s3089_s24 }
  0x72   : > { %v431_v31 = vor.u32 %v430_v25, %v4038_v16  ;;  %v4087_v44 = vshrl.u32 %v255_v21, 16  ;;  %v438_v45 = vrot.slane %v4064_v33, 1  ;;  %v4091_v46 = vshll.u32 %v4066_v34, 16  ;;  %3524 = vmatprep.subr.msk.bf16.mxu0 %vm734_vm3, %v3604_v48  ;;  %v238_v55 = vld [vmem:[%s4013_s30 + $0x98] sm:$0xff]  ;;  %v239_v0 = vld [vmem:[%s4013_s30 + $0xa0] sm:$0xff]  ;;  %v240_v1 = vld [vmem:[%s4013_s30 + $0xa8] sm:$0xff] }
  0x73   : > { %v435_v32 = vor.u32 %v434_v26, %v4040_v17  ;;  %v498_v35 = vsel %vm4050_vm2, %v433_v29, %v4035_v13  ;;  %v4095_v49 = vshll.u32 %v4071_v36, 16  ;;  %v4097_v50 = vpack.c.bf16 %v234_v39, %v233_v38  ;;  %v241_v7 = vld [vmem:[%s4013_s30 + $0xb0] sm:$0xff]  ;;  %v4156_v20 = vld [vmem:[#allocation5] sm:$0x3f]   ;;  %s2876_s26 = sshll.u32 %s5818_s17, 4  ;;  %s2863_s16 = scalar_lea.sflag [#allocation4], %s4007_s28  ;;  %s5946_s26 = int_to_ptr.vmem [resolvable:$true] %s2876_s26 }
  0x74   : > { %579 = vrot.lane.b32.xlu1 %v498_v35, %s3812_s20  ;;  %v497_v40 = vsel %vm4050_vm2, %v431_v31, %v4042_v18  ;;  %v437_v52 = vor.u32 %v436_v41, %v4074_v37  ;;  %v4105_v53 = vshrl.u32 %v4066_v34, 16  ;;  %v4107_v54 = vpack.c.bf16 %v236_v47, %v235_v42  ;;  %v243_v29 = vld [vmem:[%s4013_s30 + $0xc0] sm:$0xff]  ;;  %v244_v31 = vld [vmem:[%s4013_s30 + $0xc8] sm:$0xff]  ;;  %s3732_s10 = scalar_lea.vmem %s5946_s26, 4096  ;;  %p6038_p0 = scmp.ne.s32.totalorder %s6019_s6, 0 }
  0x75   : > { %533 = vrot.lane.b32.xlu0 %v253_v8, %s3811_s18  ;;  %v499_v43 = vsel %vm4050_vm2, %v435_v32, %v4044_v19  ;;  %v439_v56 = vor.u32 %v438_v45, %v4087_v44  ;;  %v4112_v57 = vshrl.u32 %v4071_v36, 16  ;;  %v440_v58 = vrot.slane %v4091_v46, 1  ;;  %v242_v8 = vld [vmem:[%s4013_s30 + $0xb8] sm:$0xff]  ;;  %p3733_p11 = scmp.ne.s32.totalorder %s5946_s26, %s3732_s10  ;;  %s3813_s11 = smov [#allocation8]  }
  0x76   : > { %v442_v59 = vrot.slane %v4095_v49, 1  ;;  %v4117_v60 = vshll.u32 %v4097_v50, 16  ;;  %v500_v61 = vsel %vm4050_vm2, %v437_v52, %v4060_v30  ;;  %v4125_v62 = vshll.u32 %v4107_v54, 16  ;;  %s3736_s25 = sshll.u32 %s3813_s11, 4  ;;  %s3737_s25 = int_to_ptr.vmem [resolvable:$false] %s3736_s25 }
  0x77   : > { %v4127_v63 = vpack.c.bf16 %v238_v55, %v237_v51  ;;  %v501_v2 = vsel %vm4050_vm2, %v439_v56, %v4064_v33  ;;  %v441_v3 = vor.u32 %v440_v58, %v4105_v53  ;;  %v4137_v5 = vshrl.u32 %v4097_v50, 16  ;;  %p3734_p1 = pnand %p3733_p11, %p6038_p0  ;;  %s3738_s7 = scalar_lea.vmem %s3737_s25, 8192 }
  0x78   : > { %577 = vrot.lane.b32.xlu1 %v497_v40, %s3812_s20  ;;  %v443_v4 = vor.u32 %v442_v59, %v4112_v57  ;;  %v444_v6 = vrot.slane %v4117_v60, 1  ;;  %v4143_v9 = vpack.c.bf16 %v240_v1, %v239_v0  ;;  %v4147_v10 = vshrl.u32 %v4107_v54, 16  ;;  %p3739_p7 = scmp.lt.s32.totalorder %s5946_s26, %s3737_s25  ;;  %p3740_p9 = scmp.lt.s32.totalorder %s3738_s7, %s3732_s10 }
  0x79   : > { %581 = vrot.lane.b32.xlu0 %v499_v43, %s3812_s20  ;;  %v446_v11 = vrot.slane %v4125_v62, 1  ;;  %v4154_v15 = vshll.u32 %v4127_v63, 16  ;;  %v4161_v22 = vpack.c.bf16 %v242_v8, %v241_v7  ;;  %v335_v23 = vrot.slane %v4033_v12, 7  ;;  %v245_v7 = vld [vmem:[%s4013_s30 + $0xd0] sm:$0xff]  ;;  %v246_v8 = vld [vmem:[%s4013_s30 + $0xd8] sm:$0xff]  ;;  %p3735_p3 = pneg %p3734_p1 }
  0x7a   : > { %v331_v25 = vrot.slane %v4038_v16, 7  ;;  %v503_v26 = vsel %vm4050_vm2, %v443_v4, %v4095_v49  ;;  %v4169_v27 = vor.u32 %v444_v6, %v4137_v5  ;;  %v4172_v28 = vshrl.u32 %v4143_v9, 16  ;;  %p3741_p12 = por %p3740_p9, %p3739_p7 }
  0x7b   : > { %v736_v35 = vsel %vm734_vm3, %v3604_v48, 0  ;;  %v4186_v38 = vshll.u32 %v4143_v9, 16  ;;  %v4189_v39 = vor.u32 %v4035_v13, %v335_v23  ;;  %v339_v41 = vrot.slane %v4040_v17, 7 }
  0x7c   : > { %535 = vrot.lane.b32.xlu1 %v254_v14, %s3811_s18  ;;  %v4151_v14 = vshrl.u32 %v4127_v63, 16  ;;  %v4192_v40 = vor.u32 %v4042_v18, %v331_v25  ;;  %3193 = vmatpush3.bf16.msra.mxu0 %v736_v35  ;;  %v447_v42 = vor.u32 %v446_v11, %v4147_v10  ;;  %v448_v43 = vrot.slane %v4154_v15, 1  ;;  %p3742_p2 = pnand %p3741_p12, %p3735_p3 }
  0x7d   : > { %537 = vrot.lane.b32.xlu0 %v255_v21, %s3811_s18  ;;  %v502_v21 = vsel %vm4050_vm2, %v441_v3, %v4091_v46  ;;  %3525 = vmatprep.subr.msk.bf16.mxu0 %vm734_vm3, %v4156_v20  ;;  %v343_v13 = vrot.slane %v4074_v37, 7  ;;  %v4205_v18 = vpack.c.bf16 %v244_v31, %v243_v29  ;;  %v415_v45 = vsel %vm4178_vm6, %v4033_v12, %v4189_v39 }
  0x7e   : > { %v4216_v47 = vor.u32 %v4044_v19, %v339_v41  ;;  %v4219_v48 = vshll.u32 %v4161_v22, 16  ;;  %v347_v52 = vrot.slane %v4087_v44, 7  ;;  %v351_v55 = vrot.slane %v4105_v53, 7 }
  0x7f   : > { %v4222_v51 = vor.u32 %v4060_v30, %v343_v13  ;;  %v355_v56 = vrot.slane %v4112_v57, 7  ;;  %v359_v58 = vrot.slane %v4137_v5, 7  ;;  %v363_v30 = vrot.slane %v4147_v10, 7 }
  0x80   : > { %583 = vrot.lane.b32.xlu1 %v500_v61, %s3812_s20  ;;  %v416_v19 = vsel %vm4178_vm6, %v4040_v17, %v4216_v47  ;;  %v4240_v61 = vor.u32 %v4064_v33, %v347_v52  ;;  %v4243_v0 = vor.u32 %v4091_v46, %v351_v55  ;;  %v367_v1 = vrot.slane %v4151_v14, 7  ;;  %v250_v52 = vld [vmem:[%s4013_s30 + $0xf8] sm:$0xff] }
  0x81   : > { %585 = vrot.lane.b32.xlu0 %v501_v2, %s3812_s20  ;;  %v417_v59 = vsel %vm4178_vm6, %v4074_v37, %v4222_v51  ;;  %v4247_v2 = vor.u32 %v4095_v49, %v355_v56  ;;  %v4250_v3 = vor.u32 %v4117_v60, %v359_v58  ;;  %v4253_v4 = vor.u32 %v4125_v62, %v363_v30  ;;  %v248_v56 = vld [vmem:[%s4013_s30 + $0xe8] sm:$0xff] }
  0x82   : > { %v371_v6 = vrot.slane %v4172_v28, 7  ;;  %v418_v33 = vsel %vm4178_vm6, %v4087_v44, %v4240_v61  ;;  %v419_v46 = vsel %vm4178_vm6, %v4105_v53, %v4243_v0  ;;  %v4267_v49 = vor.u32 %v4154_v15, %v367_v1 }
  0x83   : > { %v421_v23 = vsel %vm4178_vm6, %v4137_v5, %v4250_v3  ;;  %v422_v25 = vsel %vm4178_vm6, %v4147_v10, %v4253_v4  ;;  %v4294_v29 = vshrl.u32 %v4205_v18, 16  ;;  %v450_v41 = vrot.slane %v4186_v38, 1 }
  0x84   : > { %539 = vrot.lane.b32.xlu1 %v4066_v34, %s3811_s18  ;;  %v4200_v34 = vshrl.u32 %v4161_v22, 16  ;;  %v264_v13 = vpack.c.bf16 %v246_v8, %v245_v7  ;;  %v449_v58 = vor.u32 %v448_v43, %v4151_v14  ;;  %vm658_vm8 = vcmask 64512  }
  0x85   : > { %541 = vrot.lane.b32.xlu0 %v4071_v36, %s3811_s18  ;;  %v414_v36 = vsel %vm4178_vm6, %v4038_v16, %v4192_v40  ;;  %v379_v55 = vrot.slane %v4294_v29, 7  ;;  %v451_v1 = vor.u32 %v450_v41, %v4172_v28  ;;  %v452_v41 = vrot.slane %v4219_v48, 1 }
  0x86   : > { %v375_v11 = vrot.slane %v4200_v34, 7  ;;  %v506_v43 = vsel %vm4050_vm2, %v449_v58, %v4154_v15  ;;  %vm701_vm9 = vcmask 97280   ;;  %v6028_v3 = vsel %vm4178_vm6, %v4151_v14, %v4267_v49 }
  0x87   : > { %v453_v58 = vor.u32 %v452_v41, %v4200_v34 }
  0x88   : > { %587 = vrot.lane.b32.xlu1 %v502_v21, %s3812_s20  ;;  %v420_v21 = vsel %vm4178_vm6, %v4112_v57, %v4247_v2  ;;  %v4301_v35 = vor.u32 %v4219_v48, %v375_v11  ;;  %v249_v11 = vld [vmem:[%s4013_s30 + $0xf0] sm:$0xff] }
  0x89   : > { %589 = vrot.lane.b32.xlu0 %v503_v26, %s3812_s20  ;;  %v4285_v26 = vor.u32 %v4186_v38, %v371_v6  ;;  %v384_v6 = vshll.u32 %v264_v13, 16  ;;  %v508_v41 = vsel %vm4050_vm2, %v453_v58, %v4219_v48 }
  0x8a   : > { %v6030_v49 = vsel %vm4178_vm6, %v4200_v34, %v4301_v35 }
  0x8c   : > { %543 = vrot.lane.b32.xlu1 %v4097_v50, %s3811_s18  ;;  %v504_v50 = vsel %vm4050_vm2, %v4169_v27, %v4117_v60  ;;  %v424_v60 = vsel %vm4178_vm6, %v4172_v28, %v4285_v26  ;;  %v380_v27 = vshll.u32 %v4205_v18, 16 }
  0x8d   : > { %545 = vrot.lane.b32.xlu0 %v4107_v54, %s3811_s18  ;;  %v505_v54 = vsel %vm4050_vm2, %v447_v42, %v4125_v62  ;;  %v4318_v62 = vshrl.u32 %v264_v13, 16  ;;  %v247_v42 = vld [vmem:[%s4013_s30 + $0xe0] sm:$0xff] }
  0x8e   : > { %v4324_v30 = vor.u32 %v380_v27, %v379_v55  ;;  %v265_v8 = vpack.c.bf16 %v248_v56, %v247_v42  ;;  %v507_v42 = vsel %vm4050_vm2, %v451_v1, %v4186_v38  ;;  %v454_v56 = vrot.slane %v380_v27, 1 }
  0x8f   : > { %v383_v7 = vrot.slane %v4318_v62, 7 }
  0x90   : > { %591 = vrot.lane.b32.xlu1 %v504_v50, %s3812_s20  ;;  %v4344_v55 = vshrl.u32 %v265_v8, 16  ;;  %v266_v50 = vpack.c.bf16 %v250_v52, %v249_v11  ;;  %v455_v38 = vor.u32 %v454_v56, %v4294_v29 }
  0x91   : > { %593 = vrot.lane.b32.xlu0 %v505_v54, %s3812_s20  ;;  %v4336_v54 = vor.u32 %v384_v6, %v383_v7 }
  0x92   : > { %v387_v7 = vrot.slane %v4344_v55, 7  ;;  %v4355_v15 = vshrl.u32 %v266_v50, 16  ;;  %v392_v52 = vshll.u32 %v266_v50, 16  ;;  %v509_v56 = vsel %vm4050_vm2, %v455_v38, %v380_v27 }
  0x93   : > { %v6031_v35 = vsel %vm4178_vm6, %v4318_v62, %v4336_v54 }
  0x94   : > { %547 = vrot.lane.b32.xlu1 %v4127_v63, %s3811_s18  ;;  %v391_v1 = vrot.slane %v4355_v15, 7  ;;  %v460_v27 = vrot.slane %v392_v52, 1 }
  0x95   : > { %549 = vrot.lane.b32.xlu0 %v4143_v9, %s3811_s18  ;;  %v388_v9 = vshll.u32 %v265_v8, 16 }
  0x96   : > { %v461_v38 = vor.u32 %v460_v27, %v4355_v15 }
  0x97   : > { %v4359_v31 = vor.u32 %v388_v9, %v387_v7  ;;  %v458_v7 = vrot.slane %v388_v9, 1 }
  0x98   : > { %595 = vrot.lane.b32.xlu1 %v506_v43, %s3812_s20  ;;  %v4369_v43 = vor.u32 %v392_v52, %v391_v1 }
  0x99   : > { %597 = vrot.lane.b32.xlu0 %v507_v42, %s3812_s20  ;;  %v428_v11 = vsel %vm4178_vm6, %v4344_v55, %v4359_v31  ;;  %v456_v42 = vrot.slane %v384_v6, 1 }
  0x9a   : > { %v429_v63 = vsel %vm4178_vm6, %v4355_v15, %v4369_v43 }
  0x9c   : > { %551 = vrot.lane.b32.xlu1 %v4161_v22, %s3811_s18  ;;  %v457_v22 = vor.u32 %v456_v42, %v4318_v62  ;;  %v4424_v42 = vld [vmem:[#allocation5 + $0x10] sm:$0x3f]  }
  0x9d   : > { %553 = vrot.lane.b32.xlu0 %v4205_v18, %s3811_s18  ;;  %v459_v18 = vor.u32 %v458_v7, %v4344_v55 }
  0x9e   : > { %v510_v48 = vsel %vm4050_vm2, %v457_v22, %v384_v6 }
  0x9f   : > { %v511_v58 = vsel %vm4050_vm2, %v459_v18, %v388_v9 }
  0xa0   : > { %599 = vrot.lane.b32.xlu1 %v508_v41, %s3812_s20 }
  0xa1   : > { %601 = vrot.lane.b32.xlu0 %v509_v56, %s3812_s20 }
  0xa4   : > { %555 = vrot.lane.b32.xlu1 %v264_v13, %s3811_s18  ;;  %v512_v13 = vsel %vm4050_vm2, %v461_v38, %v392_v52 }
  0xa5   : > { %557 = vrot.lane.b32.xlu0 %v265_v8, %s3811_s18 }
  0xa8   : > { %603 = vrot.lane.b32.xlu1 %v510_v48, %s3812_s20 }
  0xa9   : > { %605 = vrot.lane.b32.xlu0 %v511_v58, %s3812_s20 }
  0xac   : > { %559 = vrot.lane.b32.xlu1 %v266_v50, %s3811_s18 }
  0xb0   : > { %607 = vrot.lane.b32.xlu1 %v512_v13, %s3812_s20 }
  0xdf   : > { %v532_v8 = vpop.permute.xlu0 %531 }
  0xe0   : > { %v615_v9 = vsel %vm609_vm7, %v415_v45, %v532_v8  ;;  %v905_v45 = vsel %vm734_vm3, %v4156_v20, 0 }
  0xe3   : > { %v530_v6 = vpop.permute.xlu0 %529 }
  0xe4   : > { %v612_v52 = vsel %vm609_vm7, %v414_v36, %v530_v6 }
  0xe6   : > { %v580_v1 = vpop.permute.xlu1 %579 }
  0xe7   : > { %v4406_v50 = vsel %vm658_vm8, %v615_v9, %v580_v1  ;;  %v534_v41 = vpop.permute.xlu0 %533 }
  0xe8   : > { %3194 = vmatprep.mubr.msk.bf16.mxu0 %vm701_vm9, %v4406_v50  ;;  %v618_v12 = vsel %vm609_vm7, %v416_v19, %v534_v41 }
  0xea   : > { %v578_v39 = vpop.permute.xlu1 %577 }
  0xeb   : > { %v4427_v16 = vsel %vm658_vm8, %v612_v52, %v578_v39  ;;  %v582_v40 = vpop.permute.xlu0 %581 }
  0xec   : > { %3195 = vmatmul.mubr.msk.bf16.vlgmr.msra.gmra.mrb[0].mxu0 %vm701_vm9, %v4427_v16  ;;  %v4432_v36 = vsel %vm658_vm8, %v618_v12, %v582_v40 }
  0xed   : > { %3227 = vmatpush3.bf16.msra.mxu0 %v905_v45  ;;  %3198 = vmatprep.mubr.msk.bf16.mxu0 %vm701_vm9, %v4432_v36 }
  0xee   : > { %v536_v17 = vpop.permute.xlu1 %535  ;;  %3526 = vmatprep.subr.msk.bf16.mxu0 %vm734_vm3, %v4424_v42 }
  0xef   : > { %v538_v20 = vpop.permute.xlu0 %537  ;;  %v621_v19 = vsel %vm609_vm7, %v417_v59, %v536_v17 }
  0xf0   : > { %v624_v47 = vsel %vm609_vm7, %v418_v33, %v538_v20 }
  0xf2   : > { %v584_v56 = vpop.permute.xlu1 %583 }
  0xf3   : > { %v4451_v7 = vsel %vm658_vm8, %v621_v19, %v584_v56  ;;  %v586_v22 = vpop.permute.xlu0 %585 }
  0xf4   : > { %3199 = vmatmul.mubr.msk.bf16.gmra.mrb[4].mxu0 %vm701_vm9, %v4451_v7  ;;  %v4456_v18 = vsel %vm658_vm8, %v624_v47, %v586_v22 }
  0xf5   : > { %3202 = vmatprep.mubr.msk.bf16.mxu0 %vm701_vm9, %v4456_v18 }
  0xf6   : > { %v540_v44 = vpop.permute.xlu1 %539 }
  0xf7   : > { %v542_v61 = vpop.permute.xlu0 %541  ;;  %v627_v51 = vsel %vm609_vm7, %v419_v46, %v540_v44 }
  0xf8   : > { %v630_v37 = vsel %vm609_vm7, %v420_v21, %v542_v61 }
  0xfa   : > { %v588_v59 = vpop.permute.xlu1 %587 }
  0xfb   : > { %v4473_v33 = vsel %vm658_vm8, %v627_v51, %v588_v59  ;;  %v590_v48 = vpop.permute.xlu0 %589 }
  0xfc   : > { %3203 = vmatmul.mubr.msk.bf16.gmra.mrb[8].mxu0 %vm701_vm9, %v4473_v33  ;;  %v4478_v27 = vsel %vm658_vm8, %v630_v37, %v590_v48 }
  0xfd   : > { %3206 = vmatprep.mubr.msk.bf16.mxu0 %vm701_vm9, %v4478_v27 }
  0xfe   : > { %v544_v57 = vpop.permute.xlu1 %543 }
  0xff   : > { %v546_v2 = vpop.permute.xlu0 %545  ;;  %v633_v0 = vsel %vm609_vm7, %v421_v23, %v544_v57 }
 0x100   : > { %v636_v53 = vsel %vm609_vm7, %v422_v25, %v546_v2 }
 0x102   : > { %v592_v46 = vpop.permute.xlu1 %591 }
 0x103   : > { %v4495_v21 = vsel %vm658_vm8, %v633_v0, %v592_v46  ;;  %v594_v58 = vpop.permute.xlu0 %593 }
 0x104   : > { %3207 = vmatmul.mubr.msk.bf16.gmra.mrb[12].mxu0 %vm701_vm9, %v4495_v21  ;;  %v676_v38 = vsel %vm658_vm8, %v636_v53, %v594_v58 }
 0x105   : > { %3210 = vmatprep.mubr.msk.bf16.mxu0 %vm701_vm9, %v676_v38 }
 0x106   : > { %v548_v10 = vpop.permute.xlu1 %547 }
 0x107   : > { %v550_v4 = vpop.permute.xlu0 %549  ;;  %v639_v23 = vsel %vm609_vm7, %v6028_v3, %v548_v10 }
 0x108   : > { %v642_v5 = vsel %vm609_vm7, %v424_v60, %v550_v4  ;;  %v6029_v60 = vsel %vm4178_vm6, %v4294_v29, %v4324_v30 }
 0x10a   : > { %v596_v25 = vpop.permute.xlu1 %595 }
 0x10b   : > { %v678_v13 = vsel %vm658_vm8, %v639_v23, %v596_v25  ;;  %v598_v8 = vpop.permute.xlu0 %597 }
 0x10c   : > { %3211 = vmatmul.mubr.msk.bf16.gmra.mrb[16].mxu0 %vm701_vm9, %v678_v13  ;;  %v680_v6 = vsel %vm658_vm8, %v642_v5, %v598_v8 }
 0x10d   : > { %3214 = vmatprep.mubr.msk.bf16.mxu0 %vm701_vm9, %v680_v6 }
 0x10e   : > { %v552_v28 = vpop.permute.xlu1 %551 }
 0x10f   : > { %v554_v26 = vpop.permute.xlu0 %553  ;;  %v645_v9 = vsel %vm609_vm7, %v6030_v49, %v552_v28 }
 0x110   : > { %v648_v14 = vsel %vm609_vm7, %v6029_v60, %v554_v26 }
 0x112   : > { %v600_v1 = vpop.permute.xlu1 %599 }
 0x113   : > { %v682_v41 = vsel %vm658_vm8, %v645_v9, %v600_v1  ;;  %v602_v52 = vpop.permute.xlu0 %601 }
 0x114   : > { %3215 = vmatmul.mubr.msk.bf16.gmra.mrb[20].mxu0 %vm701_vm9, %v682_v41  ;;  %v684_v12 = vsel %vm658_vm8, %v648_v14, %v602_v52 }
 0x115   : > { %3218 = vmatprep.mubr.msk.bf16.mxu0 %vm701_vm9, %v684_v12 }
 0x116   : > { %v556_v29 = vpop.permute.xlu1 %555 }
 0x117   : > { %v558_v30 = vpop.permute.xlu0 %557  ;;  %v651_v39 = vsel %vm609_vm7, %v6031_v35, %v556_v29 }
 0x118   : > { %v654_v34 = vsel %vm609_vm7, %v428_v11, %v558_v30  ;;  %v1077_v11 = vsel %vm734_vm3, %v4424_v42, 0 }
 0x11a   : > { %v604_v45 = vpop.permute.xlu1 %603 }
 0x11b   : > { %v686_v40 = vsel %vm658_vm8, %v651_v39, %v604_v45  ;;  %v606_v17 = vpop.permute.xlu0 %605 }
 0x11c   : > { %3219 = vmatmul.mubr.msk.bf16.gmra.mrb[24].mxu0 %vm701_vm9, %v686_v40  ;;  %v688_v20 = vsel %vm658_vm8, %v654_v34, %v606_v17 }
 0x11d   : > { %3222 = vmatprep.mubr.msk.bf16.mxu0 %vm701_vm9, %v688_v20 }
 0x11e   : > { %v560_v31 = vpop.permute.xlu1 %559 }
 0x11f   : > { %v657_v62 = vsel %vm609_vm7, %v429_v63, %v560_v31 }
 0x122   : > { %v608_v54 = vpop.permute.xlu1 %607 }
 0x123   : > { %v690_v55 = vsel %vm658_vm8, %v657_v62, %v608_v54 }
 0x124   : > { %3223 = vmatmul.mubr.msk.bf16.gmra.mrb[28].mxu0 %vm701_vm9, %v690_v55 }
 0x125   : > { %3228 = vmatprep.mubr.msk.bf16.mxu0 %vm701_vm9, %v4427_v16 }
 0x12c   : > { %3229 = vmatmul.mubr.msk.bf16.vlgmr.msra.gmra.mrb[0].mxu0 %vm701_vm9, %v4406_v50 }
 0x12d   : > { %3261 = vmatpush3.bf16.msra.mxu0 %v1077_v11  ;;  %3232 = vmatprep.mubr.msk.bf16.mxu0 %vm701_vm9, %v4427_v16 }
 0x134   : > { %3233 = vmatmul.mubr.msk.bf16.gmra.mrb[4].mxu0 %vm701_vm9, %v4432_v36 }
 0x135   : > { %3236 = vmatprep.mubr.msk.bf16.mxu0 %vm701_vm9, %v4451_v7 }
 0x13c   : > { %3237 = vmatmul.mubr.msk.bf16.gmra.mrb[8].mxu0 %vm701_vm9, %v4456_v18 }
 0x13d   : > { %3240 = vmatprep.mubr.msk.bf16.mxu0 %vm701_vm9, %v4473_v33 }
 0x144   : > { %3241 = vmatmul.mubr.msk.bf16.gmra.mrb[12].mxu0 %vm701_vm9, %v4478_v27 }
 0x145   : > { %3244 = vmatprep.mubr.msk.bf16.mxu0 %vm701_vm9, %v4495_v21 }
 0x14c   : > { %3245 = vmatmul.mubr.msk.bf16.gmra.mrb[16].mxu0 %vm701_vm9, %v676_v38 }
 0x14d   : > { %3248 = vmatprep.mubr.msk.bf16.mxu0 %vm701_vm9, %v678_v13 }
 0x154   : > { %3249 = vmatmul.mubr.msk.bf16.gmra.mrb[20].mxu0 %vm701_vm9, %v680_v6 }
 0x155   : > { %3252 = vmatprep.mubr.msk.bf16.mxu0 %vm701_vm9, %v682_v41 }
 0x15c   : > { %3253 = vmatmul.mubr.msk.bf16.gmra.mrb[24].mxu0 %vm701_vm9, %v684_v12 }
 0x15d   : > { %3256 = vmatprep.mubr.msk.bf16.mxu0 %vm701_vm9, %v686_v40 }
 0x164   : > { %3257 = vmatmul.mubr.msk.bf16.gmra.mrb[28].mxu0 %vm701_vm9, %v688_v20 }
 0x165   : > { %3262 = vmatprep.mubr.msk.bf16.mxu0 %vm701_vm9, %v4427_v16 }
 0x16c   : > { %3263 = vmatmul.mubr.msk.bf16.vlgmr.msra.gmra.mrb[0].mxu0 %vm701_vm9, %v4432_v36 }
 0x16d   : > { %3266 = vmatprep.mubr.msk.bf16.mxu0 %vm701_vm9, %v4451_v7 }
 0x174   : > { %3267 = vmatmul.mubr.msk.bf16.gmra.mrb[4].mxu0 %vm701_vm9, %v4456_v18 }
 0x175   : > { %3270 = vmatprep.mubr.msk.bf16.mxu0 %vm701_vm9, %v4473_v33 }
 0x17c   : > { %3271 = vmatmul.mubr.msk.bf16.gmra.mrb[8].mxu0 %vm701_vm9, %v4478_v27 }
 0x17d   : > { %3274 = vmatprep.mubr.msk.bf16.mxu0 %vm701_vm9, %v4495_v21 }
 0x184   : > { %3275 = vmatmul.mubr.msk.bf16.gmra.mrb[12].mxu0 %vm701_vm9, %v676_v38 }
 0x185   : > { %3278 = vmatprep.mubr.msk.bf16.mxu0 %vm701_vm9, %v678_v13 }
 0x18c   : > { %3279 = vmatmul.mubr.msk.bf16.gmra.mrb[16].mxu0 %vm701_vm9, %v680_v6 }
 0x18d   : > { %3282 = vmatprep.mubr.msk.bf16.mxu0 %vm701_vm9, %v682_v41 }
 0x194   : > { %3283 = vmatmul.mubr.msk.bf16.gmra.mrb[20].mxu0 %vm701_vm9, %v684_v12 }
 0x195   : > { %3286 = vmatprep.mubr.msk.bf16.mxu0 %vm701_vm9, %v686_v40 }
 0x19c   : > { %3287 = vmatmul.mubr.msk.bf16.gmra.mrb[24].mxu0 %vm701_vm9, %v688_v20 }
 0x19d   : > { %3290 = vmatprep.mubr.msk.bf16.mxu0 %vm701_vm9, %v690_v55 }
 0x1a4   : > { %3291 = vmatmul.mubr.msk.bf16.gmra.mrb[28].mxu0 %vm701_vm9, %v688_v20 }
 0x23f   : > { %v4607_v63 = vpop.f32.mrb[0].mxu0 }
 0x240   : > { %v4609_v15 = vpop.f32.mrb[1].mxu0  ;;  %v1343_v16 = vmul.f32 %v4607_v63, %v4607_v63  ;;  %v1275_v7 = vsel %vm609_vm7, %v4607_v63, 0.0 }
 0x241   : > { %v1341_v43 = vmul.f32 %v4609_v15, %v4609_v15  ;;  %v4613_v50 = vpop.f32.mrb[2].mxu0  ;;  %v1272_v36 = vsel %vm609_vm7, %v4609_v15, 0.0 }
 0x242   : > { %v4615_v42 = vpop.f32.mrb[3].mxu0  ;;  %v1344_v18 = vmul.f32 %v4613_v50, %v4613_v50  ;;  %v1376_v51 = vsel %vm609_vm7, %v1343_v16, 0.0  ;;  %v1277_v59 = vsel %vm609_vm7, %v4613_v50, 0.0 }
 0x243   : > { %v1273_v47 = vsel %vm609_vm7, %v4615_v42, 0.0  ;;  %v1342_v19 = vmul.f32 %v4615_v42, %v4615_v42  ;;  %v1373_v22 = vsel %vm609_vm7, %v1341_v43, 0.0 }
 0x244   : > { %v1274_v56 = vadd.f32 %v1273_v47, %v1272_v36  ;;  %v1378_v2 = vsel %vm609_vm7, %v1344_v18, 0.0 }
 0x245   : > { %v1374_v44 = vsel %vm609_vm7, %v1342_v19, 0.0 }
 0x246   : > { %v1276_v61 = vadd.f32 %v1275_v7, %v1274_v56  ;;  %v1375_v37 = vadd.f32 %v1374_v44, %v1373_v22 }
 0x247   : > { %v4634_v33 = vpop.f32.mrb[4].mxu0 }
 0x248   : > { %v1377_v48 = vadd.f32 %v1376_v51, %v1375_v37  ;;  %v4636_v27 = vpop.f32.mrb[5].mxu0  ;;  %v1278_v57 = vadd.f32 %v1277_v59, %v1276_v61  ;;  %v1347_v10 = vmul.f32 %v4634_v33, %v4634_v33  ;;  %v1283_v13 = vsel %vm609_vm7, %v4634_v33, 0.0 }
 0x249   : > { %v1279_v53 = vsel %vm609_vm7, %v4636_v27, 0.0  ;;  %v1345_v0 = vmul.f32 %v4636_v27, %v4636_v27  ;;  %v4643_v46 = vpop.f32.mrb[6].mxu0 }
 0x24a   : > { %v1280_v21 = vadd.f32 %v1279_v53, %v1278_v57  ;;  %v1379_v58 = vadd.f32 %v1378_v2, %v1377_v48  ;;  %v4645_v38 = vpop.f32.mrb[7].mxu0  ;;  %v1348_v8 = vmul.f32 %v4643_v46, %v4643_v46  ;;  %v1384_v60 = vsel %vm609_vm7, %v1347_v10, 0.0 }
 0x24b   : > { %v1380_v4 = vsel %vm609_vm7, %v1345_v0, 0.0  ;;  %v1281_v5 = vsel %vm609_vm7, %v4645_v38, 0.0  ;;  %v1346_v3 = vmul.f32 %v4645_v38, %v4645_v38  ;;  %v1285_v14 = vsel %vm609_vm7, %v4643_v46, 0.0 }
 0x24c   : > { %v1381_v23 = vadd.f32 %v1380_v4, %v1379_v58  ;;  %v1282_v25 = vadd.f32 %v1281_v5, %v1280_v21  ;;  %v1386_v52 = vsel %vm609_vm7, %v1348_v8, 0.0 }
 0x24d   : > { %v1382_v6 = vsel %vm609_vm7, %v1346_v3, 0.0 }
 0x24e   : > { %v1284_v28 = vadd.f32 %v1283_v13, %v1282_v25  ;;  %v1383_v26 = vadd.f32 %v1382_v6, %v1381_v23 }
 0x24f   : > { %v4662_v49 = vpop.f32.mrb[8].mxu0 }
 0x250   : > { %v1385_v9 = vadd.f32 %v1384_v60, %v1383_v26  ;;  %v4664_v1 = vpop.f32.mrb[9].mxu0  ;;  %v1286_v41 = vadd.f32 %v1285_v14, %v1284_v28  ;;  %v1351_v45 = vmul.f32 %v4662_v49, %v4662_v49  ;;  %v1291_v54 = vsel %vm609_vm7, %v4662_v49, 0.0 }
 0x251   : > { %v1287_v12 = vsel %vm609_vm7, %v4664_v1, 0.0  ;;  %v1349_v29 = vmul.f32 %v4664_v1, %v4664_v1  ;;  %v4671_v30 = vpop.f32.mrb[10].mxu0 }
 0x252   : > { %v1288_v34 = vadd.f32 %v1287_v12, %v1286_v41  ;;  %v1387_v35 = vadd.f32 %v1386_v52, %v1385_v9  ;;  %v4673_v39 = vpop.f32.mrb[11].mxu0  ;;  %v1352_v55 = vmul.f32 %v4671_v30, %v4671_v30  ;;  %v1392_v36 = vsel %vm609_vm7, %v1351_v45, 0.0 }
 0x253   : > { %v1388_v40 = vsel %vm609_vm7, %v1349_v29, 0.0  ;;  %v1289_v17 = vsel %vm609_vm7, %v4673_v39, 0.0  ;;  %v1350_v20 = vmul.f32 %v4673_v39, %v4673_v39  ;;  %v1293_v47 = vsel %vm609_vm7, %v4671_v30, 0.0 }
 0x254   : > { %v1389_v31 = vadd.f32 %v1388_v40, %v1387_v35  ;;  %v1290_v62 = vadd.f32 %v1289_v17, %v1288_v34  ;;  %v1394_v18 = vsel %vm609_vm7, %v1352_v55, 0.0 }
 0x255   : > { %v1390_v11 = vsel %vm609_vm7, %v1350_v20, 0.0 }
 0x256   : > { %v1292_v43 = vadd.f32 %v1291_v54, %v1290_v62  ;;  %v1391_v16 = vadd.f32 %v1390_v11, %v1389_v31 }
 0x257   : > { %v4690_v19 = vpop.f32.mrb[12].mxu0 }
 0x258   : > { %v1393_v56 = vadd.f32 %v1392_v36, %v1391_v16  ;;  %v4692_v7 = vpop.f32.mrb[13].mxu0  ;;  %v1294_v22 = vadd.f32 %v1293_v47, %v1292_v43  ;;  %v1355_v57 = vmul.f32 %v4690_v19, %v4690_v19  ;;  %v1299_v10 = vsel %vm609_vm7, %v4690_v19, 0.0 }
 0x259   : > { %v1295_v44 = vsel %vm609_vm7, %v4692_v7, 0.0  ;;  %v1353_v61 = vmul.f32 %v4692_v7, %v4692_v7  ;;  %v4699_v37 = vpop.f32.mrb[14].mxu0 }
 0x25a   : > { %v1296_v51 = vadd.f32 %v1295_v44, %v1294_v22  ;;  %v1395_v59 = vadd.f32 %v1394_v18, %v1393_v56  ;;  %v4701_v48 = vpop.f32.mrb[15].mxu0  ;;  %v1356_v4 = vmul.f32 %v4699_v37, %v4699_v37  ;;  %v1400_v25 = vsel %vm609_vm7, %v1355_v57, 0.0 }
 0x25b   : > { %v1396_v2 = vsel %vm609_vm7, %v1353_v61, 0.0  ;;  %v1297_v53 = vsel %vm609_vm7, %v4701_v48, 0.0  ;;  %v1354_v0 = vmul.f32 %v4701_v48, %v4701_v48  ;;  %v1301_v13 = vsel %vm609_vm7, %v4699_v37, 0.0 }
 0x25c   : > { %v1397_v21 = vadd.f32 %v1396_v2, %v1395_v59  ;;  %v1298_v58 = vadd.f32 %v1297_v53, %v1296_v51  ;;  %v1402_v60 = vsel %vm609_vm7, %v1356_v4, 0.0 }
 0x25d   : > { %v1398_v5 = vsel %vm609_vm7, %v1354_v0, 0.0 }
 0x25e   : > { %v1300_v3 = vadd.f32 %v1299_v10, %v1298_v58  ;;  %v1399_v23 = vadd.f32 %v1398_v5, %v1397_v21 }
 0x25f   : > { %v4718_v8 = vpop.f32.mrb[16].mxu0 }
 0x260   : > { %v1401_v6 = vadd.f32 %v1400_v25, %v1399_v23  ;;  %v4720_v28 = vpop.f32.mrb[17].mxu0  ;;  %v1302_v26 = vadd.f32 %v1301_v13, %v1300_v3  ;;  %v1359_v34 = vmul.f32 %v4718_v8, %v4718_v8  ;;  %v1307_v31 = vsel %vm609_vm7, %v4718_v8, 0.0 }
 0x261   : > { %v1303_v14 = vsel %vm609_vm7, %v4720_v28, 0.0  ;;  %v1357_v9 = vmul.f32 %v4720_v28, %v4720_v28  ;;  %v4727_v41 = vpop.f32.mrb[18].mxu0 }
 0x262   : > { %v1304_v52 = vadd.f32 %v1303_v14, %v1302_v26  ;;  %v1403_v12 = vadd.f32 %v1402_v60, %v1401_v6  ;;  %v4729_v29 = vpop.f32.mrb[19].mxu0  ;;  %v1360_v62 = vmul.f32 %v4727_v41, %v4727_v41  ;;  %v1408_v43 = vsel %vm609_vm7, %v1359_v34, 0.0 }
 0x263   : > { %v1404_v35 = vsel %vm609_vm7, %v1357_v9, 0.0  ;;  %v1305_v45 = vsel %vm609_vm7, %v4729_v29, 0.0  ;;  %v1358_v40 = vmul.f32 %v4729_v29, %v4729_v29  ;;  %v1309_v16 = vsel %vm609_vm7, %v4727_v41, 0.0 }
 0x264   : > { %v1405_v17 = vadd.f32 %v1404_v35, %v1403_v12  ;;  %v1306_v20 = vadd.f32 %v1305_v45, %v1304_v52  ;;  %v1410_v18 = vsel %vm609_vm7, %v1360_v62, 0.0 }
 0x265   : > { %v1406_v54 = vsel %vm609_vm7, %v1358_v40, 0.0 }
 0x266   : > { %v1308_v55 = vadd.f32 %v1307_v31, %v1306_v20  ;;  %v1407_v11 = vadd.f32 %v1406_v54, %v1405_v17 }
 0x267   : > { %v4746_v36 = vpop.f32.mrb[20].mxu0 }
 0x268   : > { %v1409_v47 = vadd.f32 %v1408_v43, %v1407_v11  ;;  %v4748_v56 = vpop.f32.mrb[21].mxu0  ;;  %v1310_v22 = vadd.f32 %v1309_v16, %v1308_v55  ;;  %v1363_v53 = vmul.f32 %v4746_v36, %v4746_v36  ;;  %v1315_v5 = vsel %vm609_vm7, %v4746_v36, 0.0 }
 0x269   : > { %v1311_v44 = vsel %vm609_vm7, %v4748_v56, 0.0  ;;  %v1361_v61 = vmul.f32 %v4748_v56, %v4748_v56  ;;  %v4755_v51 = vpop.f32.mrb[22].mxu0 }
 0x26a   : > { %v1312_v59 = vadd.f32 %v1311_v44, %v1310_v22  ;;  %v1411_v57 = vadd.f32 %v1410_v18, %v1409_v47  ;;  %v4757_v2 = vpop.f32.mrb[23].mxu0  ;;  %v1364_v3 = vmul.f32 %v4755_v51, %v4755_v51  ;;  %v1416_v6 = vsel %vm609_vm7, %v1363_v53, 0.0 }
 0x26b   : > { %v1412_v0 = vsel %vm609_vm7, %v1361_v61, 0.0  ;;  %v1313_v21 = vsel %vm609_vm7, %v4757_v2, 0.0  ;;  %v1362_v58 = vmul.f32 %v4757_v2, %v4757_v2  ;;  %v1317_v26 = vsel %vm609_vm7, %v4755_v51, 0.0 }
 0x26c   : > { %v1413_v10 = vadd.f32 %v1412_v0, %v1411_v57  ;;  %v1314_v4 = vadd.f32 %v1313_v21, %v1312_v59  ;;  %v1418_v12 = vsel %vm609_vm7, %v1364_v3, 0.0 }
 0x26d   : > { %v1414_v23 = vsel %vm609_vm7, %v1362_v58, 0.0 }
 0x26e   : > { %v1316_v25 = vadd.f32 %v1315_v5, %v1314_v4  ;;  %v1415_v13 = vadd.f32 %v1414_v23, %v1413_v10 }
 0x26f   : > { %v4774_v60 = vpop.f32.mrb[24].mxu0 }
 0x270   : > { %v1417_v14 = vadd.f32 %v1416_v6, %v1415_v13  ;;  %v4776_v9 = vpop.f32.mrb[25].mxu0  ;;  %v1318_v52 = vadd.f32 %v1317_v26, %v1316_v25  ;;  %v1367_v31 = vmul.f32 %v4774_v60, %v4774_v60  ;;  %v1323_v16 = vsel %vm609_vm7, %v4774_v60, 0.0 }
 0x271   : > { %v1319_v34 = vsel %vm609_vm7, %v4776_v9, 0.0  ;;  %v1365_v35 = vmul.f32 %v4776_v9, %v4776_v9  ;;  %v4783_v45 = vpop.f32.mrb[26].mxu0 }
 0x272   : > { %v1320_v40 = vadd.f32 %v1319_v34, %v1318_v52  ;;  %v1419_v17 = vadd.f32 %v1418_v12, %v1417_v14  ;;  %v4785_v20 = vpop.f32.mrb[27].mxu0  ;;  %v1368_v47 = vmul.f32 %v4783_v45, %v4783_v45  ;;  %v1424_v61 = vsel %vm609_vm7, %v1367_v31, 0.0 }
 0x273   : > { %v1420_v62 = vsel %vm609_vm7, %v1365_v35, 0.0  ;;  %v1321_v54 = vsel %vm609_vm7, %v4785_v20, 0.0  ;;  %v1366_v55 = vmul.f32 %v4785_v20, %v4785_v20  ;;  %v1325_v59 = vsel %vm609_vm7, %v4783_v45, 0.0 }
 0x274   : > { %v1421_v11 = vadd.f32 %v1420_v62, %v1419_v17  ;;  %v1322_v43 = vadd.f32 %v1321_v54, %v1320_v40  ;;  %v1426_v58 = vsel %vm609_vm7, %v1368_v47, 0.0 }
 0x275   : > { %v1422_v22 = vsel %vm609_vm7, %v1366_v55, 0.0 }
 0x276   : > { %v1324_v18 = vadd.f32 %v1323_v16, %v1322_v43  ;;  %v1423_v44 = vadd.f32 %v1422_v22, %v1421_v11 }
 0x277   : > { %v4802_v57 = vpop.f32.mrb[28].mxu0 }
 0x278   : > { %v1425_v53 = vadd.f32 %v1424_v61, %v1423_v44  ;;  %v4804_v0 = vpop.f32.mrb[29].mxu0  ;;  %v1326_v21 = vadd.f32 %v1325_v59, %v1324_v18  ;;  %v1371_v13 = vmul.f32 %v4802_v57, %v4802_v57  ;;  %v1331_v34 = vsel %vm609_vm7, %v4802_v57, 0.0 }
 0x279   : > { %v1327_v10 = vsel %vm609_vm7, %v4804_v0, 0.0  ;;  %v1369_v4 = vmul.f32 %v4804_v0, %v4804_v0  ;;  %v4811_v5 = vpop.f32.mrb[30].mxu0 }
 0x27a   : > { %v1328_v3 = vadd.f32 %v1327_v10, %v1326_v21  ;;  %v1427_v23 = vadd.f32 %v1426_v58, %v1425_v53  ;;  %v4813_v25 = vpop.f32.mrb[31].mxu0  ;;  %v1372_v35 = vmul.f32 %v4811_v5, %v4811_v5  ;;  %v1432_v62 = vsel %vm609_vm7, %v1371_v13, 0.0 }
 0x27b   : > { %v1428_v6 = vsel %vm609_vm7, %v1369_v4, 0.0  ;;  %v1329_v26 = vsel %vm609_vm7, %v4813_v25, 0.0  ;;  %v1370_v14 = vmul.f32 %v4813_v25, %v4813_v25  ;;  %v1333_v54 = vsel %vm609_vm7, %v4811_v5, 0.0 }
 0x27c   : > { %v1429_v52 = vadd.f32 %v1428_v6, %v1427_v23  ;;  %v1330_v12 = vadd.f32 %v1329_v26, %v1328_v3  ;;  %v1434_v43 = vsel %vm609_vm7, %v1372_v35, 0.0 }
 0x27d   : > { %v1430_v40 = vsel %vm609_vm7, %v1370_v14, 0.0 }
 0x27e   : > { %v1332_v17 = vadd.f32 %v1331_v34, %v1330_v12  ;;  %v1431_v31 = vadd.f32 %v1430_v40, %v1429_v52 }
 0x280   : > { %v1334_v55 = vadd.f32 %v1333_v54, %v1332_v17  ;;  %v1433_v11 = vadd.f32 %v1432_v62, %v1431_v31 }
 0x282   : > { %v1335_v16 = vrot.slane %v1334_v55, 4  ;;  %v1435_v47 = vadd.f32 %v1434_v43, %v1433_v11  ;;  %v4901_v43 = vld [vmem:[#allocation7 + $0x8] sm:$0x3f]  }
 0x283   : > { %3527 = vmatprep.subr.msk.bf16.mxu1 %vm734_vm3, %v4901_v43 }
 0x284   : > { %v1336_v22 = vadd.f32 %v1335_v16, %v1334_v55  ;;  %v1436_v18 = vrot.slane %v1435_v47, 4 }
 0x286   : > { %v1337_v44 = vrot.slane %v1336_v22, 2  ;;  %v1437_v61 = vadd.f32 %v1436_v18, %v1435_v47 }
 0x288   : > { %v1338_v59 = vadd.f32 %v1337_v44, %v1336_v22  ;;  %v1438_v53 = vrot.slane %v1437_v61, 2 }
 0x28a   : > { %v1339_v21 = vrot.slane %v1338_v59, 1  ;;  %v1439_v58 = vadd.f32 %v1438_v53, %v1437_v61 }
 0x28c   : > { %v1340_v10 = vadd.f32 %v1339_v21, %v1338_v59  ;;  %v1440_v4 = vrot.slane %v1439_v58, 1 }
 0x28e   : > { %v1441_v3 = vadd.f32 %v1440_v4, %v1439_v58  ;;  %v4831_v23 = vmul.f32 0.00390625, %v1340_v10 }
 0x290   : > { %v1444_v13 = vmul.f32 0.00390625, %v1441_v3  ;;  %v1445_v6 = vmul.f32 %v4831_v23, %v4831_v23  ;;  %v1477_v26 = vsub.f32 %v4813_v25, %v4831_v23  ;;  %v1448_v14 = vsub.f32 %v4609_v15, %v4831_v23 }
 0x291   : > { %v1449_v52 = vsub.f32 %v4615_v42, %v4831_v23  ;;  %v1450_v12 = vsub.f32 %v4607_v63, %v4831_v23  ;;  %v1451_v34 = vsub.f32 %v4613_v50, %v4831_v23  ;;  %v1452_v35 = vsub.f32 %v4636_v27, %v4831_v23 }
 0x292   : > { %v1446_v40 = vsub.f32 %v1444_v13, %v1445_v6  ;;  %v1453_v17 = vsub.f32 %v4645_v38, %v4831_v23  ;;  %v1454_v25 = vsub.f32 %v4634_v33, %v4831_v23  ;;  %v1455_v15 = vsub.f32 %v4643_v46, %v4831_v23 }
 0x293   : > { %v1456_v42 = vsub.f32 %v4664_v1, %v4831_v23  ;;  %v1457_v63 = vsub.f32 %v4673_v39, %v4831_v23  ;;  %v1458_v50 = vsub.f32 %v4662_v49, %v4831_v23  ;;  %v1459_v27 = vsub.f32 %v4671_v30, %v4831_v23 }
 0x294   : > { %v1447_v31 = vmax.f32 %v1446_v40, 0.0  ;;  %v1460_v38 = vsub.f32 %v4692_v7, %v4831_v23  ;;  %v1461_v33 = vsub.f32 %v4701_v48, %v4831_v23  ;;  %v1462_v46 = vsub.f32 %v4690_v19, %v4831_v23 }
 0x295   : > { %v1463_v1 = vsub.f32 %v4699_v37, %v4831_v23  ;;  %v1464_v39 = vsub.f32 %v4720_v28, %v4831_v23  ;;  %v1465_v49 = vsub.f32 %v4729_v29, %v4831_v23  ;;  %v1466_v30 = vsub.f32 %v4718_v8, %v4831_v23 }
 0x296   : > { %v1480_v62 = vadd.f32 1e-05, %v1447_v31  ;;  %v1467_v7 = vsub.f32 %v4727_v41, %v4831_v23  ;;  %v1468_v48 = vsub.f32 %v4748_v56, %v4831_v23  ;;  %v1469_v19 = vsub.f32 %v4757_v2, %v4831_v23 }
 0x297   : > { %v1470_v37 = vsub.f32 %v4746_v36, %v4831_v23  ;;  %v1471_v28 = vsub.f32 %v4755_v51, %v4831_v23  ;;  %v1472_v29 = vsub.f32 %v4776_v9, %v4831_v23  ;;  %v1473_v8 = vsub.f32 %v4785_v20, %v4831_v23 }
 0x298   : > { %3610 = vrsqrt.f32 %v1480_v62  ;;  %v1474_v41 = vsub.f32 %v4774_v60, %v4831_v23  ;;  %v1475_v56 = vsub.f32 %v4783_v45, %v4831_v23  ;;  %v1476_v2 = vsub.f32 %v4804_v0, %v4831_v23 }
 0x299   : > { %v1478_v36 = vsub.f32 %v4802_v57, %v4831_v23  ;;  %v1479_v51 = vsub.f32 %v4811_v5, %v4831_v23 }
 0x2a2   : > { %v3611_v9 = vpop.eup %3610 }
 0x2a3   : > { %v4899_v54 = vmul.f32 %v3611_v9, %v1477_v26  ;;  %v1484_v20 = vmul.f32 %v3611_v9, %v1450_v12  ;;  %v1485_v55 = vmul.f32 %v3611_v9, %v1451_v34  ;;  %v1482_v11 = vmul.f32 %v3611_v9, %v1448_v14 }
 0x2a4   : > { %v1483_v60 = vmul.f32 %v3611_v9, %v1449_v52  ;;  %v1486_v16 = vmul.f32 %v3611_v9, %v1452_v35  ;;  %v1487_v45 = vmul.f32 %v3611_v9, %v1453_v17  ;;  %v1488_v47 = vmul.f32 %v3611_v9, %v1454_v25 }
 0x2a5   : > { %v1516_v22 = vmax.f32 %v1484_v20, 0.0  ;;  %v1517_v0 = vmax.f32 %v1485_v55, 0.0  ;;  %v1489_v18 = vmul.f32 %v3611_v9, %v1455_v15  ;;  %v1490_v57 = vmul.f32 %v3611_v9, %v1456_v42 }
 0x2a6   : > { %v1491_v5 = vmul.f32 %v3611_v9, %v1457_v63  ;;  %v1492_v44 = vmul.f32 %v3611_v9, %v1458_v50  ;;  %v1493_v61 = vmul.f32 %v3611_v9, %v1459_v27  ;;  %v4905_v53 = vmul.f32 %v3611_v9, %v1460_v38 }
 0x2a7   : > { %v1547_v59 = vpack.c.bf16 %v1517_v0, %v1516_v22  ;;  %v4907_v21 = vmul.f32 %v3611_v9, %v1461_v33  ;;  %v1496_v58 = vmul.f32 %v3611_v9, %v1462_v46  ;;  %v1497_v10 = vmul.f32 %v3611_v9, %v1463_v1 }
 0x2a8   : > { %v4909_v4 = vmul.f32 %v3611_v9, %v1464_v39  ;;  %v4911_v3 = vmul.f32 %v3611_v9, %v1465_v49  ;;  %v4913_v23 = vmul.f32 %v3611_v9, %v1466_v30  ;;  %v4918_v6 = vmul.f32 %v3611_v9, %v1467_v7 }
 0x2a9   : > { %1818 = vrot.lane.b32.xlu1 %v1547_v59, %s3811_s18  ;;  %v4916_v13 = vshrl.u32 %v1547_v59, 16  ;;  %v4920_v26 = vmul.f32 %v3611_v9, %v1468_v48  ;;  %v4922_v14 = vmul.f32 %v3611_v9, %v1469_v19  ;;  %v4924_v52 = vmul.f32 %v3611_v9, %v1470_v37 }
 0x2aa   : > { %v4926_v12 = vmul.f32 %v3611_v9, %v1471_v28  ;;  %v4928_v34 = vmul.f32 %v3611_v9, %v1472_v29  ;;  %v4930_v35 = vmul.f32 %v3611_v9, %v1473_v8  ;;  %v4932_v40 = vmul.f32 %v3611_v9, %v1474_v41 }
 0x2ab   : > { %v4934_v17 = vmul.f32 %v3611_v9, %v1475_v56  ;;  %v4936_v25 = vmul.f32 %v3611_v9, %v1476_v2  ;;  %v4938_v15 = vmul.f32 %v3611_v9, %v1478_v36  ;;  %v4940_v42 = vmul.f32 %v3611_v9, %v1479_v51 }
 0x2ac   : > { %v1514_v63 = vmax.f32 %v1482_v11, 0.0  ;;  %v1515_v50 = vmax.f32 %v1483_v60, 0.0  ;;  %v4942_v27 = vshll.u32 %v1547_v59, 16  ;;  %v1520_v31 = vmax.f32 %v1488_v47, 0.0 }
 0x2ad   : > { %v1521_v38 = vmax.f32 %v1489_v18, 0.0  ;;  %v1518_v33 = vmax.f32 %v1486_v16, 0.0  ;;  %v1519_v46 = vmax.f32 %v1487_v45, 0.0  ;;  %v1524_v49 = vmax.f32 %v1492_v44, 0.0 }
 0x2ae   : > { %v1546_v1 = vpack.c.bf16 %v1515_v50, %v1514_v63  ;;  %v1722_v39 = vrot.slane %v4942_v27, 1  ;;  %v1525_v30 = vmax.f32 %v1493_v61, 0.0  ;;  %v1522_v48 = vmax.f32 %v1490_v57, 0.0 }
 0x2af   : > { %v1549_v62 = vpack.c.bf16 %v1521_v38, %v1520_v31  ;;  %v1548_v7 = vpack.c.bf16 %v1519_v46, %v1518_v33  ;;  %v1523_v19 = vmax.f32 %v1491_v5, 0.0  ;;  %v1528_v20 = vmax.f32 %v1496_v58, 0.0 }
 0x2b0   : > { %1820 = vrot.lane.b32.xlu0 %v1546_v1, %s3811_s18  ;;  %v1723_v37 = vor.u32 %v1722_v39, %v4916_v13  ;;  %v4947_v28 = vshll.u32 %v1546_v1, 16  ;;  %v1551_v29 = vpack.c.bf16 %v1525_v30, %v1524_v49  ;;  %v4953_v56 = vshrl.u32 %v1546_v1, 16 }
 0x2b1   : > { %v4949_v8 = vshll.u32 %v1549_v62, 16  ;;  %v4951_v41 = vshll.u32 %v1548_v7, 16  ;;  %v1550_v51 = vpack.c.bf16 %v1523_v19, %v1522_v48  ;;  %v4962_v11 = vshrl.u32 %v1549_v62, 16 }
 0x2b2   : > { %v1786_v2 = vsel %vm4050_vm2, %v1723_v37, %v4942_v27  ;;  %v1724_v36 = vrot.slane %v4947_v28, 1  ;;  %v1529_v60 = vmax.f32 %v1497_v10, 0.0  ;;  %v4965_v45 = vshll.u32 %v1551_v29, 16 }
 0x2b3   : > { %1866 = vrot.lane.b32.xlu1 %v1786_v2, %s3812_s20  ;;  %v1728_v9 = vrot.slane %v4949_v8, 1  ;;  %v1726_v16 = vrot.slane %v4951_v41, 1  ;;  %v1526_v47 = vmax.f32 %v4905_v53, 0.0  ;;  %v1527_v57 = vmax.f32 %v4907_v21, 0.0 }
 0x2b4   : > { %v1725_v55 = vor.u32 %v1724_v36, %v4953_v56  ;;  %v4972_v18 = vpack.c.bf16 %v1529_v60, %v1528_v20  ;;  %v1532_v5 = vmax.f32 %v4913_v23, 0.0  ;;  %v4978_v44 = vshrl.u32 %v1548_v7, 16 }
 0x2b5   : > { %v1729_v0 = vor.u32 %v1728_v9, %v4962_v11  ;;  %v4980_v61 = vshll.u32 %v1550_v51, 16  ;;  %v4982_v59 = vpack.c.bf16 %v1527_v57, %v1526_v47  ;;  %v1732_v53 = vrot.slane %v4965_v45, 1 }
 0x2b6   : > { %v1787_v22 = vsel %vm4050_vm2, %v1725_v55, %v4947_v28  ;;  %v1533_v58 = vmax.f32 %v4918_v6, 0.0  ;;  %v1530_v10 = vmax.f32 %v4909_v4, 0.0  ;;  %v1531_v21 = vmax.f32 %v4911_v3, 0.0 }
 0x2b7   : > { %1868 = vrot.lane.b32.xlu0 %v1787_v22, %s3812_s20  ;;  %1824 = vrot.lane.b32.xlu1 %v1549_v62, %s3811_s18  ;;  %v1789_v63 = vsel %vm4050_vm2, %v1729_v0, %v4949_v8  ;;  %v1727_v23 = vor.u32 %v1726_v16, %v4978_v44  ;;  %v4992_v50 = vshrl.u32 %v1551_v29, 16  ;;  %v4995_v31 = vshll.u32 %v4972_v18, 16 }
 0x2b8   : > { %v4999_v6 = vpack.c.bf16 %v1533_v58, %v1532_v5  ;;  %v5001_v4 = vpack.c.bf16 %v1531_v21, %v1530_v10  ;;  %v1536_v3 = vmax.f32 %v4924_v52, 0.0  ;;  %v1537_v38 = vmax.f32 %v4926_v12, 0.0  ;;  %v5073_v21 = vld [vmem:[#allocation7] sm:$0x3f]  }
 0x2b9   : > { %v1730_v33 = vrot.slane %v4980_v61, 1  ;;  %v5007_v46 = vshll.u32 %v4982_v59, 16  ;;  %v1534_v1 = vmax.f32 %v4920_v26, 0.0  ;;  %v1535_v39 = vmax.f32 %v4922_v14, 0.0 }
 0x2ba   : > { %v5011_v49 = vshrl.u32 %v1550_v51, 16  ;;  %v1733_v30 = vor.u32 %v1732_v53, %v4992_v50  ;;  %v5015_v62 = vshll.u32 %v4999_v6, 16  ;;  %v1788_v52 = vsel %vm4050_vm2, %v1727_v23, %v4951_v41 }
 0x2bb   : > { %1822 = vrot.lane.b32.xlu0 %v1548_v7, %s3811_s18  ;;  %1872 = vrot.lane.b32.xlu1 %v1789_v63, %s3812_s20  ;;  %v5021_v12 = vshll.u32 %v5001_v4, 16  ;;  %v5023_v7 = vpack.c.bf16 %v1537_v38, %v1536_v3  ;;  %v5025_v48 = vpack.c.bf16 %v1535_v39, %v1534_v1  ;;  %v1736_v26 = vrot.slane %v4995_v31, 1 }
 0x2bc   : > { %v1540_v14 = vmax.f32 %v4932_v40, 0.0  ;;  %v1541_v19 = vmax.f32 %v4934_v17, 0.0  ;;  %v1543_v37 = vmax.f32 %v4899_v54, 0.0  ;;  %v1731_v2 = vor.u32 %v1730_v33, %v5011_v49 }
 0x2bd   : > { %v1734_v36 = vrot.slane %v5007_v46, 1  ;;  %v1791_v9 = vsel %vm4050_vm2, %v1733_v30, %v4965_v45  ;;  %v5039_v20 = vshrl.u32 %v4972_v18, 16  ;;  %v5045_v40 = vshrl.u32 %v4982_v59, 16 }
 0x2be   : > { %v5042_v55 = vpack.c.bf16 %v1541_v19, %v1540_v14  ;;  %v1738_v54 = vrot.slane %v5021_v12, 1  ;;  %v1538_v17 = vmax.f32 %v4928_v34, 0.0  ;;  %v1539_v60 = vmax.f32 %v4930_v35, 0.0 }
 0x2bf   : > { %1870 = vrot.lane.b32.xlu0 %v1788_v52, %s3812_s20  ;;  %1828 = vrot.lane.b32.xlu1 %v1551_v29, %s3811_s18  ;;  %v1740_v29 = vrot.slane %v5015_v62, 1  ;;  %v1737_v16 = vor.u32 %v1736_v26, %v5039_v20  ;;  %v5054_v47 = vshrl.u32 %v4999_v6, 16  ;;  %v5057_v22 = vshll.u32 %v5023_v7, 16 }
 0x2c0   : > { %v1544_v0 = vmax.f32 %v4938_v15, 0.0  ;;  %v1735_v57 = vor.u32 %v1734_v36, %v5045_v40  ;;  %v5062_v34 = vshrl.u32 %v5001_v4, 16  ;;  %v5064_v35 = vpack.c.bf16 %v1539_v60, %v1538_v17 }
 0x2c1   : > { %v5068_v5 = vor.u32 %v1740_v29, %v5054_v47  ;;  %v1542_v53 = vmax.f32 %v4936_v25, 0.0  ;;  %v1626_v58 = vrot.slane %v4916_v13, 7  ;;  %v1630_v10 = vrot.slane %v4953_v56, 7 }
 0x2c2   : > { %v1790_v15 = vsel %vm4050_vm2, %v1731_v2, %v4980_v61  ;;  %v5079_v63 = vor.u32 %v1738_v54, %v5062_v34  ;;  %v1744_v25 = vrot.slane %v5057_v22, 1  ;;  %v2021_v38 = vsel %vm734_vm3, %v4901_v43, 0 }
 0x2c3   : > { %1826 = vrot.lane.b32.xlu0 %v1550_v51, %s3811_s18  ;;  %1876 = vrot.lane.b32.xlu1 %v1791_v9, %s3812_s20  ;;  %v1545_v51 = vmax.f32 %v4940_v42, 0.0  ;;  %v5082_v42 = vshll.u32 %v5025_v48, 16  ;;  %v5090_v3 = vpack.c.bf16 %v1543_v37, %v1542_v53  ;;  %v1793_v33 = vsel %vm4050_vm2, %v1737_v16, %v4995_v31 }
 0x2c4   : > { %v5098_v1 = vor.u32 %v4942_v27, %v1626_v58  ;;  %v5101_v39 = vor.u32 %v4947_v28, %v1630_v10  ;;  %3295 = vmatpush3.bf16.msra.mxu1 %v2021_v38  ;;  %v1795_v43 = vsel %vm4050_vm2, %v5068_v5, %v5015_v62  ;;  %v5111_v30 = vshrl.u32 %v5023_v7, 16 }
 0x2c5   : > { %v5088_v23 = vpack.c.bf16 %v1545_v51, %v1544_v0  ;;  %v5114_v52 = vshrl.u32 %v5025_v48, 16  ;;  %3528 = vmatprep.subr.msk.bf16.mxu1 %vm734_vm3, %v5073_v21  ;;  %v1794_v27 = vsel %vm4050_vm2, %v5079_v63, %v5021_v12  ;;  %v1742_v28 = vrot.slane %v5082_v42, 1 }
 0x2c6   : > { %v1706_v26 = vsel %vm4178_vm6, %v4916_v13, %v5098_v1  ;;  %v1707_v14 = vsel %vm4178_vm6, %v4953_v56, %v5101_v39  ;;  %v1745_v19 = vor.u32 %v1744_v25, %v5111_v30  ;;  %v5136_v37 = vshrl.u32 %v5042_v55, 16  ;;  %v5335_v1 = vld [vmem:[#allocation7 + $0x10] sm:$0x3f]  }
 0x2c7   : > { %1874 = vrot.lane.b32.xlu0 %v1790_v15, %s3812_s20  ;;  %1832 = vrot.lane.b32.xlu1 %v4972_v18, %s3811_s18  ;;  %v1792_v18 = vsel %vm4050_vm2, %v1735_v57, %v5007_v46  ;;  %v5139_v2 = vshll.u32 %v5042_v55, 16  ;;  %v1638_v36 = vrot.slane %v4962_v11, 7  ;;  %v5143_v9 = vshrl.u32 %v5064_v35, 16 }
 0x2c8   : > { %v1634_v29 = vrot.slane %v4978_v44, 7  ;;  %v1646_v54 = vrot.slane %v4992_v50, 7  ;;  %v5149_v17 = vshll.u32 %v5064_v35, 16  ;;  %v5152_v60 = vshrl.u32 %v5088_v23, 16 }
 0x2c9   : > { %v5155_v16 = vor.u32 %v4949_v8, %v1638_v36  ;;  %v1654_v0 = vrot.slane %v5039_v20, 7  ;;  %v1650_v53 = vrot.slane %v5045_v40, 7  ;;  %v5172_v8 = vshrl.u32 %v5090_v3, 16 }
 0x2ca   : > { %v5159_v57 = vor.u32 %v4951_v41, %v1634_v29  ;;  %v5162_v51 = vor.u32 %v4965_v45, %v1646_v54  ;;  %v1687_v58 = vshll.u32 %v5088_v23, 16  ;;  %v1662_v45 = vrot.slane %v5054_v47, 7 }
 0x2cb   : > { %1830 = vrot.lane.b32.xlu0 %v4982_v59, %s3811_s18  ;;  %1880 = vrot.lane.b32.xlu1 %v1793_v33, %s3812_s20  ;;  %v1642_v59 = vrot.slane %v5011_v49, 7  ;;  %v1709_v41 = vsel %vm4178_vm6, %v4962_v11, %v5155_v16  ;;  %v5193_v15 = vor.u32 %v4995_v31, %v1654_v0  ;;  %v5196_v63 = vor.u32 %v5007_v46, %v1650_v53 }
 0x2cc   : > { %v5199_v25 = vor.u32 %v5015_v62, %v1662_v45  ;;  %v1658_v38 = vrot.slane %v5062_v34, 7  ;;  %v1670_v33 = vrot.slane %v5111_v30, 7  ;;  %v1666_v36 = vrot.slane %v5114_v52, 7 }
 0x2cd   : > { %v5165_v5 = vor.u32 %v4980_v61, %v1642_v59  ;;  %v1708_v61 = vsel %vm4178_vm6, %v4978_v44, %v5159_v57  ;;  %v1678_v31 = vrot.slane %v5136_v37, 7  ;;  %v1674_v29 = vrot.slane %v5143_v9, 7 }
 0x2ce   : > { %v1712_v46 = vsel %vm4178_vm6, %v5045_v40, %v5196_v63  ;;  %v1715_v62 = vsel %vm4178_vm6, %v5054_v47, %v5199_v25  ;;  %v5222_v54 = vor.u32 %v5021_v12, %v1658_v38  ;;  %v1686_v59 = vrot.slane %v5152_v60, 7 }
 0x2cf   : > { %1878 = vrot.lane.b32.xlu0 %v1792_v18, %s3812_s20  ;;  %1836 = vrot.lane.b32.xlu1 %v4999_v6, %s3811_s18  ;;  %v1711_v6 = vsel %vm4178_vm6, %v4992_v50, %v5162_v51  ;;  %v1710_v10 = vsel %vm4178_vm6, %v5011_v49, %v5165_v5  ;;  %v1713_v18 = vsel %vm4178_vm6, %v5039_v20, %v5193_v15  ;;  %v1683_v45 = vshll.u32 %v5090_v3, 16 }
 0x2d0   : > { %v5226_v0 = vor.u32 %v5057_v22, %v1670_v33  ;;  %v5235_v53 = vor.u32 %v5149_v17, %v1674_v29  ;;  %v1714_v12 = vsel %vm4178_vm6, %v5062_v34, %v5222_v54  ;;  %v5242_v38 = vor.u32 %v1687_v58, %v1686_v59 }
 0x2d1   : > { %v1682_v33 = vrot.slane %v5172_v8, 7  ;;  %v1797_v59 = vsel %vm4050_vm2, %v1745_v19, %v5057_v22  ;;  %v2190_v13 = vsel %vm734_vm3, %v5073_v21, 0  ;;  %v2362_v32 = vsel %vm734_vm3, %v5335_v1, 0 }
 0x2d3   : > { %1834 = vrot.lane.b32.xlu0 %v5001_v4, %s3811_s18  ;;  %1884 = vrot.lane.b32.xlu1 %v1795_v43, %s3812_s20  ;;  %v5229_v4 = vor.u32 %v5082_v42, %v1666_v36  ;;  %v5232_v43 = vor.u32 %v5139_v2, %v1678_v31  ;;  %v5268_v36 = vor.u32 %v1683_v45, %v1682_v33  ;;  %v1746_v31 = vrot.slane %v5149_v17, 1 }
 0x2d5   : > { %v6033_v54 = vsel %vm4178_vm6, %v5114_v52, %v5229_v4  ;;  %v6035_v4 = vsel %vm4178_vm6, %v5143_v9, %v5235_v53  ;;  %v6037_v53 = vsel %vm4178_vm6, %v5172_v8, %v5268_v36 }
 0x2d7   : > { %1882 = vrot.lane.b32.xlu0 %v1794_v27, %s3812_s20  ;;  %1840 = vrot.lane.b32.xlu1 %v5023_v7, %s3811_s18  ;;  %v1743_v7 = vor.u32 %v1742_v28, %v5114_v52  ;;  %v1748_v27 = vrot.slane %v5139_v2, 1  ;;  %v1752_v28 = vrot.slane %v1687_v58, 1 }
 0x2d9   : > { %v1796_v33 = vsel %vm4050_vm2, %v1743_v7, %v5082_v42  ;;  %v1749_v29 = vor.u32 %v1748_v27, %v5136_v37  ;;  %v1753_v19 = vor.u32 %v1752_v28, %v5152_v60 }
 0x2db   : > { %1838 = vrot.lane.b32.xlu0 %v5025_v48, %s3811_s18  ;;  %1888 = vrot.lane.b32.xlu1 %v1797_v59, %s3812_s20  ;;  %v1799_v22 = vsel %vm4050_vm2, %v1749_v29, %v5139_v2  ;;  %v1747_v48 = vor.u32 %v1746_v31, %v5143_v9  ;;  %v1750_v59 = vrot.slane %v1683_v45, 1 }
 0x2dd   : > { %v1798_v42 = vsel %vm4050_vm2, %v1747_v48, %v5149_v17  ;;  %v1751_v2 = vor.u32 %v1750_v59, %v5172_v8 }
 0x2df   : > { %1886 = vrot.lane.b32.xlu0 %v1796_v33, %s3812_s20  ;;  %1844 = vrot.lane.b32.xlu1 %v5042_v55, %s3811_s18  ;;  %v1801_v55 = vsel %vm4050_vm2, %v1753_v19, %v1687_v58 }
 0x2e3   : > { %1842 = vrot.lane.b32.xlu0 %v5064_v35, %s3811_s18  ;;  %1892 = vrot.lane.b32.xlu1 %v1799_v22, %s3812_s20  ;;  %v1800_v35 = vsel %vm4050_vm2, %v1751_v2, %v1683_v45 }
 0x2e7   : > { %1890 = vrot.lane.b32.xlu0 %v1798_v42, %s3812_s20  ;;  %1848 = vrot.lane.b32.xlu1 %v5088_v23, %s3811_s18 }
 0x2eb   : > { %1846 = vrot.lane.b32.xlu0 %v5090_v3, %s3811_s18  ;;  %1896 = vrot.lane.b32.xlu1 %v1801_v55, %s3812_s20 }
 0x2ef   : > { %1894 = vrot.lane.b32.xlu0 %v1800_v35, %s3812_s20 }
 0x31b   : > { %v1819_v17 = vpop.permute.xlu1 %1818 }
 0x31c   : > { %v1900_v23 = vsel %vm609_vm7, %v1706_v26, %v1819_v17 }
 0x322   : > { %v1821_v31 = vpop.permute.xlu0 %1820 }
 0x323   : > { %v1903_v24 = vsel %vm609_vm7, %v1707_v14, %v1821_v31 }
 0x325   : > { %v1867_v29 = vpop.permute.xlu1 %1866 }
 0x326   : > { %v5328_v3 = vsel %vm658_vm8, %v1900_v23, %v1867_v29  ;;  %v6034_v29 = vsel %vm4178_vm6, %v5136_v37, %v5232_v43 }
 0x329   : > { %v1869_v58 = vpop.permute.xlu0 %1868  ;;  %v1825_v45 = vpop.permute.xlu1 %1824 }
 0x32a   : > { %v5331_v7 = vsel %vm658_vm8, %v1903_v24, %v1869_v58  ;;  %v1909_v21 = vsel %vm609_vm7, %v1709_v41, %v1825_v45 }
 0x32b   : > { %3296 = vmatprep.mubr.msk.bf16.mxu1 %vm701_vm9, %v5331_v7 }
 0x32c   : > { %3297 = vmatmul.mubr.msk.bf16.vlgmr.msra.gmra.mrb[0].mxu1 %vm701_vm9, %v5328_v3 }
 0x32d   : > { %3329 = vmatpush3.bf16.msra.mxu1 %v2190_v13  ;;  %v1823_v56 = vpop.permute.xlu0 %1822  ;;  %v1873_v39 = vpop.permute.xlu1 %1872 }
 0x32e   : > { %3529 = vmatprep.subr.msk.bf16.mxu1 %vm734_vm3, %v5335_v1  ;;  %v1906_v26 = vsel %vm609_vm7, %v1708_v61, %v1823_v56  ;;  %v5356_v14 = vsel %vm658_vm8, %v1909_v21, %v1873_v39  ;;  %v6036_v56 = vsel %vm4178_vm6, %v5152_v60, %v5242_v38 }
 0x331   : > { %v1871_v27 = vpop.permute.xlu0 %1870  ;;  %v1829_v33 = vpop.permute.xlu1 %1828 }
 0x332   : > { %v5359_v22 = vsel %vm658_vm8, %v1906_v26, %v1871_v27  ;;  %v1915_v44 = vsel %vm609_vm7, %v1711_v6, %v1829_v33 }
 0x333   : > { %3300 = vmatprep.mubr.msk.bf16.mxu1 %vm701_vm9, %v5359_v22 }
 0x334   : > { %3301 = vmatmul.mubr.msk.bf16.gmra.mrb[4].mxu1 %vm701_vm9, %v5356_v14 }
 0x335   : > { %v1827_v11 = vpop.permute.xlu0 %1826  ;;  %v1877_v16 = vpop.permute.xlu1 %1876 }
 0x336   : > { %v1912_v57 = vsel %vm609_vm7, %v1710_v10, %v1827_v11  ;;  %v5378_v41 = vsel %vm658_vm8, %v1915_v44, %v1877_v16 }
 0x339   : > { %v1875_v61 = vpop.permute.xlu0 %1874  ;;  %v1833_v48 = vpop.permute.xlu1 %1832 }
 0x33a   : > { %v5381_v28 = vsel %vm658_vm8, %v1912_v57, %v1875_v61  ;;  %v1921_v49 = vsel %vm609_vm7, %v1713_v18, %v1833_v48 }
 0x33b   : > { %3304 = vmatprep.mubr.msk.bf16.mxu1 %vm701_vm9, %v5381_v28 }
 0x33c   : > { %3305 = vmatmul.mubr.msk.bf16.gmra.mrb[8].mxu1 %vm701_vm9, %v5378_v41 }
 0x33d   : > { %v1831_v50 = vpop.permute.xlu0 %1830  ;;  %v1881_v51 = vpop.permute.xlu1 %1880 }
 0x33e   : > { %v1918_v5 = vsel %vm609_vm7, %v1712_v46, %v1831_v50  ;;  %v5400_v6 = vsel %vm658_vm8, %v1921_v49, %v1881_v51 }
 0x341   : > { %v1879_v10 = vpop.permute.xlu0 %1878  ;;  %v1837_v42 = vpop.permute.xlu1 %1836 }
 0x342   : > { %v5403_v19 = vsel %vm658_vm8, %v1918_v5, %v1879_v10  ;;  %v1927_v40 = vsel %vm609_vm7, %v1715_v62, %v1837_v42  ;;  %v6032_v62 = vsel %vm4178_vm6, %v5111_v30, %v5226_v0 }
 0x343   : > { %3308 = vmatprep.mubr.msk.bf16.mxu1 %vm701_vm9, %v5403_v19 }
 0x344   : > { %3309 = vmatmul.mubr.msk.bf16.gmra.mrb[12].mxu1 %vm701_vm9, %v5400_v6 }
 0x345   : > { %v1835_v20 = vpop.permute.xlu0 %1834  ;;  %v1885_v15 = vpop.permute.xlu1 %1884 }
 0x346   : > { %v1924_v63 = vsel %vm609_vm7, %v1714_v12, %v1835_v20  ;;  %v1965_v18 = vsel %vm658_vm8, %v1927_v40, %v1885_v15 }
 0x349   : > { %v1883_v46 = vpop.permute.xlu0 %1882  ;;  %v1841_v59 = vpop.permute.xlu1 %1840 }
 0x34a   : > { %v1963_v55 = vsel %vm658_vm8, %v1924_v63, %v1883_v46  ;;  %v1933_v34 = vsel %vm609_vm7, %v6032_v62, %v1841_v59 }
 0x34b   : > { %3312 = vmatprep.mubr.msk.bf16.mxu1 %vm701_vm9, %v1963_v55 }
 0x34c   : > { %3313 = vmatmul.mubr.msk.bf16.gmra.mrb[16].mxu1 %vm701_vm9, %v1965_v18 }
 0x34d   : > { %v1839_v47 = vpop.permute.xlu0 %1838  ;;  %v1889_v25 = vpop.permute.xlu1 %1888 }
 0x34e   : > { %v1930_v12 = vsel %vm609_vm7, %v6033_v54, %v1839_v47  ;;  %v1969_v2 = vsel %vm658_vm8, %v1933_v34, %v1889_v25 }
 0x351   : > { %v1887_v35 = vpop.permute.xlu0 %1886  ;;  %v1845_v17 = vpop.permute.xlu1 %1844 }
 0x352   : > { %v1967_v31 = vsel %vm658_vm8, %v1930_v12, %v1887_v35  ;;  %v1939_v52 = vsel %vm609_vm7, %v6034_v29, %v1845_v17 }
 0x353   : > { %3316 = vmatprep.mubr.msk.bf16.mxu1 %vm701_vm9, %v1967_v31 }
 0x354   : > { %3317 = vmatmul.mubr.msk.bf16.gmra.mrb[20].mxu1 %vm701_vm9, %v1969_v2 }
 0x355   : > { %v1843_v30 = vpop.permute.xlu0 %1842  ;;  %v1893_v0 = vpop.permute.xlu1 %1892 }
 0x356   : > { %v1936_v23 = vsel %vm609_vm7, %v6035_v4, %v1843_v30  ;;  %v1973_v24 = vsel %vm658_vm8, %v1939_v52, %v1893_v0 }
 0x359   : > { %v1891_v58 = vpop.permute.xlu0 %1890  ;;  %v1849_v45 = vpop.permute.xlu1 %1848 }
 0x35a   : > { %v1971_v13 = vsel %vm658_vm8, %v1936_v23, %v1891_v58  ;;  %v1945_v9 = vsel %vm609_vm7, %v6036_v56, %v1849_v45 }
 0x35b   : > { %3320 = vmatprep.mubr.msk.bf16.mxu1 %vm701_vm9, %v1971_v13 }
 0x35c   : > { %3321 = vmatmul.mubr.msk.bf16.gmra.mrb[24].mxu1 %vm701_vm9, %v1973_v24 }
 0x35d   : > { %v1847_v37 = vpop.permute.xlu0 %1846  ;;  %v1897_v43 = vpop.permute.xlu1 %1896 }
 0x35e   : > { %v1942_v39 = vsel %vm609_vm7, %v6037_v53, %v1847_v37  ;;  %v1977_v21 = vsel %vm658_vm8, %v1945_v9, %v1897_v43 }
 0x361   : > { %v1895_v26 = vpop.permute.xlu0 %1894 }
 0x362   : > { %v1975_v27 = vsel %vm658_vm8, %v1942_v39, %v1895_v26 }
 0x363   : > { %3324 = vmatprep.mubr.msk.bf16.mxu1 %vm701_vm9, %v1975_v27 }
 0x364   : > { %3325 = vmatmul.mubr.msk.bf16.gmra.mrb[28].mxu1 %vm701_vm9, %v1977_v21 }
 0x365   : > { %3330 = vmatprep.mubr.msk.bf16.mxu1 %vm701_vm9, %v5328_v3 }
 0x36c   : > { %3331 = vmatmul.mubr.msk.bf16.vlgmr.msra.gmra.mrb[0].mxu1 %vm701_vm9, %v5331_v7 }
 0x36d   : > { %3363 = vmatpush3.bf16.msra.mxu1 %v2362_v32  ;;  %3334 = vmatprep.mubr.msk.bf16.mxu1 %vm701_vm9, %v5328_v3 }
 0x374   : > { %3335 = vmatmul.mubr.msk.bf16.gmra.mrb[4].mxu1 %vm701_vm9, %v5359_v22 }
 0x375   : > { %3338 = vmatprep.mubr.msk.bf16.mxu1 %vm701_vm9, %v5356_v14 }
 0x37c   : > { %3339 = vmatmul.mubr.msk.bf16.gmra.mrb[8].mxu1 %vm701_vm9, %v5381_v28 }
 0x37d   : > { %3342 = vmatprep.mubr.msk.bf16.mxu1 %vm701_vm9, %v5378_v41 }
 0x384   : > { %3343 = vmatmul.mubr.msk.bf16.gmra.mrb[12].mxu1 %vm701_vm9, %v5403_v19 }
 0x385   : > { %3346 = vmatprep.mubr.msk.bf16.mxu1 %vm701_vm9, %v5400_v6 }
 0x38c   : > { %3347 = vmatmul.mubr.msk.bf16.gmra.mrb[16].mxu1 %vm701_vm9, %v1963_v55 }
 0x38d   : > { %3350 = vmatprep.mubr.msk.bf16.mxu1 %vm701_vm9, %v1965_v18 }
 0x394   : > { %3351 = vmatmul.mubr.msk.bf16.gmra.mrb[20].mxu1 %vm701_vm9, %v1967_v31 }
 0x395   : > { %3354 = vmatprep.mubr.msk.bf16.mxu1 %vm701_vm9, %v1969_v2 }
 0x39c   : > { %3355 = vmatmul.mubr.msk.bf16.gmra.mrb[24].mxu1 %vm701_vm9, %v1971_v13 }
 0x39d   : > { %3358 = vmatprep.mubr.msk.bf16.mxu1 %vm701_vm9, %v1973_v24 }
 0x3a4   : > { %3359 = vmatmul.mubr.msk.bf16.gmra.mrb[28].mxu1 %vm701_vm9, %v1975_v27 }
 0x3a5   : > { %3364 = vmatprep.mubr.msk.bf16.mxu1 %vm701_vm9, %v5328_v3 }
 0x3ac   : > { %3365 = vmatmul.mubr.msk.bf16.vlgmr.msra.gmra.mrb[0].mxu1 %vm701_vm9, %v5359_v22 }
 0x3ad   : > { %3368 = vmatprep.mubr.msk.bf16.mxu1 %vm701_vm9, %v5356_v14 }
 0x3b4   : > { %3369 = vmatmul.mubr.msk.bf16.gmra.mrb[4].mxu1 %vm701_vm9, %v5381_v28 }
 0x3b5   : > { %3372 = vmatprep.mubr.msk.bf16.mxu1 %vm701_vm9, %v5378_v41 }
 0x3bc   : > { %3373 = vmatmul.mubr.msk.bf16.gmra.mrb[8].mxu1 %vm701_vm9, %v5403_v19 }
 0x3bd   : > { %3376 = vmatprep.mubr.msk.bf16.mxu1 %vm701_vm9, %v5400_v6 }
 0x3c4   : > { %3377 = vmatmul.mubr.msk.bf16.gmra.mrb[12].mxu1 %vm701_vm9, %v1963_v55 }
 0x3c5   : > { %3380 = vmatprep.mubr.msk.bf16.mxu1 %vm701_vm9, %v1965_v18 }
 0x3cc   : > { %3381 = vmatmul.mubr.msk.bf16.gmra.mrb[16].mxu1 %vm701_vm9, %v1967_v31 }
 0x3cd   : > { %3384 = vmatprep.mubr.msk.bf16.mxu1 %vm701_vm9, %v1969_v2 }
 0x3d4   : > { %3385 = vmatmul.mubr.msk.bf16.gmra.mrb[20].mxu1 %vm701_vm9, %v1971_v13 }
 0x3d5   : > { %3388 = vmatprep.mubr.msk.bf16.mxu1 %vm701_vm9, %v1973_v24 }
 0x3dc   : > { %3389 = vmatmul.mubr.msk.bf16.gmra.mrb[24].mxu1 %vm701_vm9, %v1975_v27 }
 0x3dd   : > { %3392 = vmatprep.mubr.msk.bf16.mxu1 %vm701_vm9, %v1977_v21 }
 0x3e4   : > { %3393 = vmatmul.mubr.msk.bf16.gmra.mrb[28].mxu1 %vm701_vm9, %v1975_v27 }
 0x47f   : > { %v5523_v60 = vpop.f32.mrb[0].mxu1 }
 0x480   : > { %v5525_v8 = vpop.f32.mrb[1].mxu1  ;;  %v2628_v7 = vmul.f32 %v5523_v60, %v5523_v60  ;;  %v2560_v11 = vsel %vm609_vm7, %v5523_v60, 0.0 }
 0x481   : > { %v2626_v38 = vmul.f32 %v5525_v8, %v5525_v8  ;;  %v5529_v36 = vpop.f32.mrb[2].mxu1  ;;  %v2557_v1 = vsel %vm609_vm7, %v5525_v8, 0.0 }
 0x482   : > { %v5531_v3 = vpop.f32.mrb[3].mxu1  ;;  %v2629_v44 = vmul.f32 %v5529_v36, %v5529_v36  ;;  %v2661_v48 = vsel %vm609_vm7, %v2628_v7, 0.0  ;;  %v2562_v28 = vsel %vm609_vm7, %v5529_v36, 0.0 }
 0x483   : > { %v2558_v14 = vsel %vm609_vm7, %v5531_v3, 0.0  ;;  %v2627_v33 = vmul.f32 %v5531_v3, %v5531_v3  ;;  %v2658_v16 = vsel %vm609_vm7, %v2626_v38, 0.0 }
 0x484   : > { %v2559_v22 = vadd.f32 %v2558_v14, %v2557_v1  ;;  %v2663_v6 = vsel %vm609_vm7, %v2629_v44, 0.0 }
 0x485   : > { %v2659_v57 = vsel %vm609_vm7, %v2627_v33, 0.0 }
 0x486   : > { %v2561_v41 = vadd.f32 %v2560_v11, %v2559_v22  ;;  %v2660_v61 = vadd.f32 %v2659_v57, %v2658_v16 }
 0x487   : > { %v5550_v50 = vpop.f32.mrb[4].mxu1 }
 0x488   : > { %v2662_v51 = vadd.f32 %v2661_v48, %v2660_v61  ;;  %v5552_v49 = vpop.f32.mrb[5].mxu1  ;;  %v2563_v5 = vadd.f32 %v2562_v28, %v2561_v41  ;;  %v2632_v63 = vmul.f32 %v5550_v50, %v5550_v50  ;;  %v2568_v25 = vsel %vm609_vm7, %v5550_v50, 0.0 }
 0x489   : > { %v2564_v10 = vsel %vm609_vm7, %v5552_v49, 0.0  ;;  %v2630_v42 = vmul.f32 %v5552_v49, %v5552_v49  ;;  %v5559_v19 = vpop.f32.mrb[6].mxu1 }
 0x48a   : > { %v2565_v20 = vadd.f32 %v2564_v10, %v2563_v5  ;;  %v2664_v15 = vadd.f32 %v2663_v6, %v2662_v51  ;;  %v5561_v40 = vpop.f32.mrb[7].mxu1  ;;  %v2633_v62 = vmul.f32 %v5559_v19, %v5559_v19  ;;  %v2669_v2 = vsel %vm609_vm7, %v2632_v63, 0.0 }
 0x48b   : > { %v2665_v18 = vsel %vm609_vm7, %v2630_v42, 0.0  ;;  %v2566_v46 = vsel %vm609_vm7, %v5561_v40, 0.0  ;;  %v2631_v59 = vmul.f32 %v5561_v40, %v5561_v40  ;;  %v2570_v35 = vsel %vm609_vm7, %v5559_v19, 0.0 }
 0x48c   : > { %v2666_v55 = vadd.f32 %v2665_v18, %v2664_v15  ;;  %v2567_v47 = vadd.f32 %v2566_v46, %v2565_v20  ;;  %v2671_v29 = vsel %vm609_vm7, %v2633_v62, 0.0 }
 0x48d   : > { %v2667_v34 = vsel %vm609_vm7, %v2631_v59, 0.0 }
 0x48e   : > { %v2569_v54 = vadd.f32 %v2568_v25, %v2567_v47  ;;  %v2668_v12 = vadd.f32 %v2667_v34, %v2666_v55 }
 0x48f   : > { %v5578_v17 = vpop.f32.mrb[8].mxu1 }
 0x490   : > { %v2670_v31 = vadd.f32 %v2669_v2, %v2668_v12  ;;  %v5580_v30 = vpop.f32.mrb[9].mxu1  ;;  %v2571_v0 = vadd.f32 %v2570_v35, %v2569_v54  ;;  %v2636_v13 = vmul.f32 %v5578_v17, %v5578_v17  ;;  %v2576_v39 = vsel %vm609_vm7, %v5578_v17, 0.0 }
 0x491   : > { %v2572_v52 = vsel %vm609_vm7, %v5580_v30, 0.0  ;;  %v2634_v4 = vmul.f32 %v5580_v30, %v5580_v30  ;;  %v5587_v23 = vpop.f32.mrb[10].mxu1 }
 0x492   : > { %v2573_v24 = vadd.f32 %v2572_v52, %v2571_v0  ;;  %v2672_v58 = vadd.f32 %v2671_v29, %v2670_v31  ;;  %v5589_v45 = vpop.f32.mrb[11].mxu1  ;;  %v2637_v21 = vmul.f32 %v5587_v23, %v5587_v23  ;;  %v2677_v38 = vsel %vm609_vm7, %v2636_v13, 0.0 }
 0x493   : > { %v2673_v37 = vsel %vm609_vm7, %v2634_v4, 0.0  ;;  %v2574_v43 = vsel %vm609_vm7, %v5589_v45, 0.0  ;;  %v2635_v56 = vmul.f32 %v5589_v45, %v5589_v45  ;;  %v2578_v7 = vsel %vm609_vm7, %v5587_v23, 0.0 }
 0x494   : > { %v2674_v9 = vadd.f32 %v2673_v37, %v2672_v58  ;;  %v2575_v53 = vadd.f32 %v2574_v43, %v2573_v24  ;;  %v2679_v11 = vsel %vm609_vm7, %v2637_v21, 0.0 }
 0x495   : > { %v2675_v26 = vsel %vm609_vm7, %v2635_v56, 0.0 }
 0x496   : > { %v2577_v27 = vadd.f32 %v2576_v39, %v2575_v53  ;;  %v2676_v32 = vadd.f32 %v2675_v26, %v2674_v9 }
 0x497   : > { %v5606_v1 = vpop.f32.mrb[12].mxu1 }
 0x498   : > { %v2678_v14 = vadd.f32 %v2677_v38, %v2676_v32  ;;  %v5608_v33 = vpop.f32.mrb[13].mxu1  ;;  %v2579_v22 = vadd.f32 %v2578_v7, %v2577_v27  ;;  %v2640_v28 = vmul.f32 %v5606_v1, %v5606_v1  ;;  %v2584_v20 = vsel %vm609_vm7, %v5606_v1, 0.0 }
 0x499   : > { %v2580_v16 = vsel %vm609_vm7, %v5608_v33, 0.0  ;;  %v2638_v44 = vmul.f32 %v5608_v33, %v5608_v33  ;;  %v5615_v57 = vpop.f32.mrb[14].mxu1 }
 0x49a   : > { %v2581_v41 = vadd.f32 %v2580_v16, %v2579_v22  ;;  %v2680_v61 = vadd.f32 %v2679_v11, %v2678_v14  ;;  %v5617_v48 = vpop.f32.mrb[15].mxu1  ;;  %v2641_v15 = vmul.f32 %v5615_v57, %v5615_v57  ;;  %v2685_v59 = vsel %vm609_vm7, %v2640_v28, 0.0 }
 0x49b   : > { %v2681_v51 = vsel %vm609_vm7, %v2638_v44, 0.0  ;;  %v2582_v5 = vsel %vm609_vm7, %v5617_v48, 0.0  ;;  %v2639_v6 = vmul.f32 %v5617_v48, %v5617_v48  ;;  %v2586_v55 = vsel %vm609_vm7, %v5615_v57, 0.0 }
 0x49c   : > { %v2682_v10 = vadd.f32 %v2681_v51, %v2680_v61  ;;  %v2583_v42 = vadd.f32 %v2582_v5, %v2581_v41  ;;  %v2687_v54 = vsel %vm609_vm7, %v2641_v15, 0.0 }
 0x49d   : > { %v2683_v63 = vsel %vm609_vm7, %v2639_v6, 0.0 }
 0x49e   : > { %v2585_v18 = vadd.f32 %v2584_v20, %v2583_v42  ;;  %v2684_v46 = vadd.f32 %v2683_v63, %v2682_v10 }
 0x49f   : > { %v5634_v47 = vpop.f32.mrb[16].mxu1 }
 0x4a0   : > { %v2686_v25 = vadd.f32 %v2685_v59, %v2684_v46  ;;  %v5636_v62 = vpop.f32.mrb[17].mxu1  ;;  %v2587_v34 = vadd.f32 %v2586_v55, %v2585_v18  ;;  %v2644_v52 = vmul.f32 %v5634_v47, %v5634_v47  ;;  %v2592_v43 = vsel %vm609_vm7, %v5634_v47, 0.0 }
 0x4a1   : > { %v2588_v12 = vsel %vm609_vm7, %v5636_v62, 0.0  ;;  %v2642_v2 = vmul.f32 %v5636_v62, %v5636_v62  ;;  %v5643_v35 = vpop.f32.mrb[18].mxu1 }
 0x4a2   : > { %v2589_v31 = vadd.f32 %v2588_v12, %v2587_v34  ;;  %v2688_v0 = vadd.f32 %v2687_v54, %v2686_v25  ;;  %v5645_v29 = vpop.f32.mrb[19].mxu1  ;;  %v2645_v56 = vmul.f32 %v5643_v35, %v5643_v35  ;;  %v2693_v21 = vsel %vm609_vm7, %v2644_v52, 0.0 }
 0x4a3   : > { %v2689_v4 = vsel %vm609_vm7, %v2642_v2, 0.0  ;;  %v2590_v24 = vsel %vm609_vm7, %v5645_v29, 0.0  ;;  %v2643_v58 = vmul.f32 %v5645_v29, %v5645_v29  ;;  %v2594_v26 = vsel %vm609_vm7, %v5643_v35, 0.0 }
 0x4a4   : > { %v2690_v13 = vadd.f32 %v2689_v4, %v2688_v0  ;;  %v2591_v37 = vadd.f32 %v2590_v24, %v2589_v31  ;;  %v2695_v14 = vsel %vm609_vm7, %v2645_v56, 0.0 }
 0x4a5   : > { %v2691_v9 = vsel %vm609_vm7, %v2643_v58, 0.0 }
 0x4a6   : > { %v2593_v53 = vadd.f32 %v2592_v43, %v2591_v37  ;;  %v2692_v39 = vadd.f32 %v2691_v9, %v2690_v13 }
 0x4a7   : > { %v5662_v27 = vpop.f32.mrb[20].mxu1 }
 0x4a8   : > { %v2694_v32 = vadd.f32 %v2693_v21, %v2692_v39  ;;  %v5664_v38 = vpop.f32.mrb[21].mxu1  ;;  %v2595_v7 = vadd.f32 %v2594_v26, %v2593_v53  ;;  %v2648_v28 = vmul.f32 %v5662_v27, %v5662_v27  ;;  %v2600_v20 = vsel %vm609_vm7, %v5662_v27, 0.0 }
 0x4a9   : > { %v2596_v22 = vsel %vm609_vm7, %v5664_v38, 0.0  ;;  %v2646_v11 = vmul.f32 %v5664_v38, %v5664_v38  ;;  %v5671_v16 = vpop.f32.mrb[22].mxu1 }
 0x4aa   : > { %v2597_v44 = vadd.f32 %v2596_v22, %v2595_v7  ;;  %v2696_v41 = vadd.f32 %v2695_v14, %v2694_v32  ;;  %v5673_v61 = vpop.f32.mrb[23].mxu1  ;;  %v2649_v15 = vmul.f32 %v5671_v16, %v5671_v16  ;;  %v2701_v59 = vsel %vm609_vm7, %v2648_v28, 0.0 }
 0x4ab   : > { %v2697_v51 = vsel %vm609_vm7, %v2646_v11, 0.0  ;;  %v2598_v5 = vsel %vm609_vm7, %v5673_v61, 0.0  ;;  %v2647_v6 = vmul.f32 %v5673_v61, %v5673_v61  ;;  %v2602_v55 = vsel %vm609_vm7, %v5671_v16, 0.0 }
 0x4ac   : > { %v2698_v10 = vadd.f32 %v2697_v51, %v2696_v41  ;;  %v2599_v42 = vadd.f32 %v2598_v5, %v2597_v44  ;;  %v2703_v2 = vsel %vm609_vm7, %v2649_v15, 0.0 }
 0x4ad   : > { %v2699_v63 = vsel %vm609_vm7, %v2647_v6, 0.0 }
 0x4ae   : > { %v2601_v18 = vadd.f32 %v2600_v20, %v2599_v42  ;;  %v2700_v46 = vadd.f32 %v2699_v63, %v2698_v10 }
 0x4af   : > { %v5690_v25 = vpop.f32.mrb[24].mxu1 }
 0x4b0   : > { %v2702_v34 = vadd.f32 %v2701_v59, %v2700_v46  ;;  %v5692_v54 = vpop.f32.mrb[25].mxu1  ;;  %v2603_v12 = vadd.f32 %v2602_v55, %v2601_v18  ;;  %v2652_v13 = vmul.f32 %v5690_v25, %v5690_v25  ;;  %v2608_v39 = vsel %vm609_vm7, %v5690_v25, 0.0 }
 0x4b1   : > { %v2604_v31 = vsel %vm609_vm7, %v5692_v54, 0.0  ;;  %v2650_v0 = vmul.f32 %v5692_v54, %v5692_v54  ;;  %v5699_v52 = vpop.f32.mrb[26].mxu1 }
 0x4b2   : > { %v2605_v4 = vadd.f32 %v2604_v31, %v2603_v12  ;;  %v2704_v24 = vadd.f32 %v2703_v2, %v2702_v34  ;;  %v5701_v58 = vpop.f32.mrb[27].mxu1  ;;  %v2653_v21 = vmul.f32 %v5699_v52, %v5699_v52  ;;  %v2709_v14 = vsel %vm609_vm7, %v2652_v13, 0.0 }
 0x4b3   : > { %v2705_v37 = vsel %vm609_vm7, %v2650_v0, 0.0  ;;  %v2606_v43 = vsel %vm609_vm7, %v5701_v58, 0.0  ;;  %v2651_v56 = vmul.f32 %v5701_v58, %v5701_v58  ;;  %v2610_v22 = vsel %vm609_vm7, %v5699_v52, 0.0 }
 0x4b4   : > { %v2706_v9 = vadd.f32 %v2705_v37, %v2704_v24  ;;  %v2607_v53 = vadd.f32 %v2606_v43, %v2605_v4  ;;  %v2711_v51 = vsel %vm609_vm7, %v2653_v21, 0.0 }
 0x4b5   : > { %v2707_v26 = vsel %vm609_vm7, %v2651_v56, 0.0 }
 0x4b6   : > { %v2609_v32 = vadd.f32 %v2608_v39, %v2607_v53  ;;  %v2708_v7 = vadd.f32 %v2707_v26, %v2706_v9 }
 0x4b7   : > { %v5718_v11 = vpop.f32.mrb[28].mxu1 }
 0x4b8   : > { %v2710_v44 = vadd.f32 %v2709_v14, %v2708_v7  ;;  %v5720_v41 = vpop.f32.mrb[29].mxu1  ;;  %v2611_v28 = vadd.f32 %v2610_v22, %v2609_v32  ;;  %v2656_v63 = vmul.f32 %v5718_v11, %v5718_v11  ;;  %v2616_v12 = vsel %vm609_vm7, %v5718_v11, 0.0 }
 0x4b9   : > { %v2612_v5 = vsel %vm609_vm7, %v5720_v41, 0.0  ;;  %v2654_v6 = vmul.f32 %v5720_v41, %v5720_v41  ;;  %v5727_v10 = vpop.f32.mrb[30].mxu1 }
 0x4ba   : > { %v2613_v42 = vadd.f32 %v2612_v5, %v2611_v28  ;;  %v2712_v20 = vadd.f32 %v2711_v51, %v2710_v44  ;;  %v5729_v15 = vpop.f32.mrb[31].mxu1  ;;  %v2657_v2 = vmul.f32 %v5727_v10, %v5727_v10  ;;  %v2717_v24 = vsel %vm609_vm7, %v2656_v63, 0.0 }
 0x4bb   : > { %v2713_v18 = vsel %vm609_vm7, %v2654_v6, 0.0  ;;  %v2614_v46 = vsel %vm609_vm7, %v5729_v15, 0.0  ;;  %v2655_v59 = vmul.f32 %v5729_v15, %v5729_v15  ;;  %v2618_v13 = vsel %vm609_vm7, %v5727_v10, 0.0 }
 0x4bc   : > { %v2714_v55 = vadd.f32 %v2713_v18, %v2712_v20  ;;  %v2615_v34 = vadd.f32 %v2614_v46, %v2613_v42  ;;  %v2719_v56 = vsel %vm609_vm7, %v2657_v2, 0.0 }
 0x4bd   : > { %v2715_v31 = vsel %vm609_vm7, %v2655_v59, 0.0 }
 0x4be   : > { %v2617_v0 = vadd.f32 %v2616_v12, %v2615_v34  ;;  %v2716_v4 = vadd.f32 %v2715_v31, %v2714_v55 }
 0x4c0   : > { %v2619_v37 = vadd.f32 %v2618_v13, %v2617_v0  ;;  %v2718_v43 = vadd.f32 %v2717_v24, %v2716_v4 }
 0x4c2   : > { %v2620_v9 = vrot.slane %v2619_v37, 4  ;;  %v2720_v53 = vadd.f32 %v2719_v56, %v2718_v43 }
 0x4c4   : > { %v2621_v39 = vadd.f32 %v2620_v9, %v2619_v37  ;;  %v2721_v21 = vrot.slane %v2720_v53, 4 }
 0x4c6   : > { %v2622_v26 = vrot.slane %v2621_v39, 2  ;;  %v2722_v32 = vadd.f32 %v2721_v21, %v2720_v53 }
 0x4c8   : > { %v2623_v7 = vadd.f32 %v2622_v26, %v2621_v39  ;;  %v2723_v14 = vrot.slane %v2722_v32, 2 }
 0x4ca   : > { %v2624_v22 = vrot.slane %v2623_v7, 1  ;;  %v2724_v44 = vadd.f32 %v2723_v14, %v2722_v32 }
 0x4cc   : > { %v2625_v28 = vadd.f32 %v2624_v22, %v2623_v7  ;;  %v2725_v51 = vrot.slane %v2724_v44, 1 }
 0x4ce   : > { %v2726_v5 = vadd.f32 %v2725_v51, %v2724_v44  ;;  %v5747_v6 = vmul.f32 0.00390625, %v2625_v28 }
 0x4d0   : > { %v2728_v42 = vmul.f32 0.00390625, %v2726_v5  ;;  %v2729_v20 = vmul.f32 %v5747_v6, %v5747_v6  ;;  %v2761_v63 = vsub.f32 %v5729_v15, %v5747_v6  ;;  %v2732_v18 = vsub.f32 %v5525_v8, %v5747_v6 }
 0x4d1   : > { %v2733_v46 = vsub.f32 %v5531_v3, %v5747_v6  ;;  %v2734_v59 = vsub.f32 %v5523_v60, %v5747_v6  ;;  %v2735_v55 = vsub.f32 %v5529_v36, %v5747_v6  ;;  %v2736_v34 = vsub.f32 %v5552_v49, %v5747_v6 }
 0x4d2   : > { %v2730_v12 = vsub.f32 %v2728_v42, %v2729_v20  ;;  %v2737_v2 = vsub.f32 %v5561_v40, %v5747_v6  ;;  %v2738_v15 = vsub.f32 %v5550_v50, %v5747_v6  ;;  %v2739_v8 = vsub.f32 %v5559_v19, %v5747_v6 }
 0x4d3   : > { %v2740_v3 = vsub.f32 %v5580_v30, %v5747_v6  ;;  %v2741_v60 = vsub.f32 %v5589_v45, %v5747_v6  ;;  %v2742_v36 = vsub.f32 %v5578_v17, %v5747_v6  ;;  %v2743_v49 = vsub.f32 %v5587_v23, %v5747_v6 }
 0x4d4   : > { %v2731_v31 = vmax.f32 %v2730_v12, 0.0  ;;  %v2744_v40 = vsub.f32 %v5608_v33, %v5747_v6  ;;  %v2745_v50 = vsub.f32 %v5617_v48, %v5747_v6  ;;  %v2746_v19 = vsub.f32 %v5606_v1, %v5747_v6  ;;  %v3615_v12 = vld [vmem:[%s4013_s30] sm:$0xff] }
 0x4d5   : > { %v2747_v30 = vsub.f32 %v5615_v57, %v5747_v6  ;;  %v2748_v45 = vsub.f32 %v5636_v62, %v5747_v6  ;;  %v2749_v17 = vsub.f32 %v5645_v29, %v5747_v6  ;;  %v2750_v23 = vsub.f32 %v5634_v47, %v5747_v6 }
 0x4d6   : > { %v2764_v0 = vadd.f32 1e-05, %v2731_v31  ;;  %v2751_v33 = vsub.f32 %v5643_v35, %v5747_v6  ;;  %v2752_v48 = vsub.f32 %v5664_v38, %v5747_v6  ;;  %v2753_v1 = vsub.f32 %v5673_v61, %v5747_v6  ;;  %v3619_v31 = vld [vmem:[%s4013_s30 + $0x20] sm:$0xff] }
 0x4d7   : > { %v2754_v57 = vsub.f32 %v5662_v27, %v5747_v6  ;;  %v2755_v62 = vsub.f32 %v5671_v16, %v5747_v6  ;;  %v2756_v29 = vsub.f32 %v5692_v54, %v5747_v6  ;;  %v2757_v47 = vsub.f32 %v5701_v58, %v5747_v6 }
 0x4d8   : > { %3612 = vrsqrt.f32 %v2764_v0  ;;  %v2758_v35 = vsub.f32 %v5690_v25, %v5747_v6  ;;  %v2759_v38 = vsub.f32 %v5699_v52, %v5747_v6  ;;  %v2760_v27 = vsub.f32 %v5720_v41, %v5747_v6  ;;  %v3614_v52 = vld [vmem:[%s4013_s30 + $0xe8] sm:$0xff]  ;;  %v3623_v0 = vld [vmem:[%s4013_s30 + $0x40] sm:$0xff] }
 0x4d9   : > { %v2762_v16 = vsub.f32 %v5718_v11, %v5747_v6  ;;  %v2763_v61 = vsub.f32 %v5727_v10, %v5747_v6 }
 0x4e2   : > { %v3613_v54 = vpop.eup %3612 }
 0x4e3   : > { %v2795_v4 = vmul.f32 %v3613_v54, %v2761_v63  ;;  %v2766_v58 = vmul.f32 %v3613_v54, %v2732_v18  ;;  %v2767_v24 = vmul.f32 %v3613_v54, %v2733_v46  ;;  %v2768_v13 = vmul.f32 %v3613_v54, %v2734_v59 }
 0x4e4   : > { %v2769_v37 = vmul.f32 %v3613_v54, %v2735_v55  ;;  %v2770_v25 = vmul.f32 %v3613_v54, %v2736_v34  ;;  %v2771_v43 = vmul.f32 %v3613_v54, %v2737_v2  ;;  %v2772_v56 = vmul.f32 %v3613_v54, %v2738_v15  ;;  %v3616_v15 = vld [vmem:[%s4013_s30 + $0x8] sm:$0xff] }
 0x4e5   : > { %v2827_v9 = vadd.f32 %v3614_v52, %v2795_v4  ;;  %v2773_v53 = vmul.f32 %v3613_v54, %v2739_v8  ;;  %v2774_v41 = vmul.f32 %v3613_v54, %v2740_v3  ;;  %v2775_v39 = vmul.f32 %v3613_v54, %v2741_v60  ;;  %v3617_v3 = vld [vmem:[%s4013_s30 + $0x10] sm:$0xff]  ;;  %v3630_v4 = vld [vmem:[%s4013_s30 + $0x78] sm:$0xff] }
 0x4e6   : > { %v2776_v21 = vmul.f32 %v3613_v54, %v2742_v36  ;;  %v2777_v11 = vmul.f32 %v3613_v54, %v2743_v49  ;;  %v2778_v26 = vmul.f32 %v3613_v54, %v2744_v40  ;;  %v2779_v32 = vmul.f32 %v3613_v54, %v2745_v50  ;;  %v3618_v36 = vld [vmem:[%s4013_s30 + $0x18] sm:$0xff]  ;;  %v3620_v50 = vld [vmem:[%s4013_s30 + $0x28] sm:$0xff] }
 0x4e7   : > { %2859 = vst.msk [vmem:[%s5818_s17 + $0xe8] sm:$0xff] %vm609_vm7, %v2827_v9  ;;  %v2780_v10 = vmul.f32 %v3613_v54, %v2746_v19  ;;  %v2781_v7 = vmul.f32 %v3613_v54, %v2747_v30  ;;  %v2782_v14 = vmul.f32 %v3613_v54, %v2748_v45  ;;  %v2783_v22 = vmul.f32 %v3613_v54, %v2749_v17  ;;  %v3621_v30 = vld [vmem:[%s4013_s30 + $0x30] sm:$0xff]  ;;  %v3622_v17 = vld [vmem:[%s4013_s30 + $0x38] sm:$0xff] }
 0x4e8   : > { %v2784_v44 = vmul.f32 %v3613_v54, %v2750_v23  ;;  %v5822_v28 = vmul.f32 %v3613_v54, %v2751_v33  ;;  %v5824_v51 = vmul.f32 %v3613_v54, %v2752_v48  ;;  %v5826_v5 = vmul.f32 %v3613_v54, %v2753_v1  ;;  %v3624_v48 = vld [vmem:[%s4013_s30 + $0x48] sm:$0xff]  ;;  %v3634_v52 = vld [vmem:[%s4013_s30 + $0x98] sm:$0xff] }
 0x4e9   : > { %v5828_v6 = vmul.f32 %v3613_v54, %v2754_v57  ;;  %v5830_v42 = vmul.f32 %v3613_v54, %v2755_v62  ;;  %v5832_v20 = vmul.f32 %v3613_v54, %v2756_v29  ;;  %v5834_v63 = vmul.f32 %v3613_v54, %v2757_v47  ;;  %v3625_v57 = vld [vmem:[%s4013_s30 + $0x50] sm:$0xff]  ;;  %v3626_v29 = vld [vmem:[%s4013_s30 + $0x58] sm:$0xff] }
 0x4ea   : > { %v5836_v18 = vmul.f32 %v3613_v54, %v2758_v35  ;;  %v5838_v46 = vmul.f32 %v3613_v54, %v2759_v38  ;;  %v5840_v59 = vmul.f32 %v3613_v54, %v2760_v27  ;;  %v5842_v55 = vmul.f32 %v3613_v54, %v2762_v16  ;;  %v3627_v35 = vld [vmem:[%s4013_s30 + $0x60] sm:$0xff]  ;;  %v3628_v27 = vld [vmem:[%s4013_s30 + $0x68] sm:$0xff] }
 0x4eb   : > { %v5844_v34 = vmul.f32 %v3613_v54, %v2763_v61  ;;  %v2798_v2 = vadd.f32 %v3615_v12, %v2766_v58  ;;  %v2799_v8 = vadd.f32 %v3616_v15, %v2767_v24  ;;  %v2800_v60 = vadd.f32 %v3617_v3, %v2768_v13  ;;  %v3629_v61 = vld [vmem:[%s4013_s30 + $0x70] sm:$0xff]  ;;  %v3631_v24 = vld [vmem:[%s4013_s30 + $0x80] sm:$0xff]  ;;  %v3645_v12 = vld [vmem:[%s4013_s30 + $0xf8] sm:$0xff] }
 0x4ec   : > { %v2801_v49 = vadd.f32 %v3618_v36, %v2769_v37  ;;  %v2802_v40 = vadd.f32 %v3619_v31, %v2770_v25  ;;  %v2803_v19 = vadd.f32 %v3620_v50, %v2771_v43  ;;  %v2804_v45 = vadd.f32 %v3621_v30, %v2772_v56  ;;  %v3632_v37 = vld [vmem:[%s4013_s30 + $0x88] sm:$0xff]  ;;  %v3633_v43 = vld [vmem:[%s4013_s30 + $0x90] sm:$0xff] }
 0x4ed   : > { %v2805_v23 = vadd.f32 %v3622_v17, %v2773_v53  ;;  %v2806_v33 = vadd.f32 %v3623_v0, %v2774_v41  ;;  %v2807_v1 = vadd.f32 %v3624_v48, %v2775_v39  ;;  %v2808_v62 = vadd.f32 %v3625_v57, %v2776_v21  ;;  %2830 = vst.msk [vmem:[%s5818_s17] sm:$0xff] %vm609_vm7, %v2798_v2  ;;  %v3635_v53 = vld [vmem:[%s4013_s30 + $0xa0] sm:$0xff]  ;;  %v3636_v39 = vld [vmem:[%s4013_s30 + $0xa8] sm:$0xff] }
 0x4ee   : > { %2831 = vst.msk [vmem:[%s5818_s17 + $0x8] sm:$0xff] %vm609_vm7, %v2799_v8  ;;  %2832 = vst.msk [vmem:[%s5818_s17 + $0x10] sm:$0xff] %vm609_vm7, %v2800_v60  ;;  %v2809_v47 = vadd.f32 %v3626_v29, %v2777_v11  ;;  %v2810_v38 = vadd.f32 %v3627_v35, %v2778_v26  ;;  %v2811_v16 = vadd.f32 %v3628_v27, %v2779_v32  ;;  %v3637_v11 = vld [vmem:[%s4013_s30 + $0xb0] sm:$0xff]  ;;  %v3638_v32 = vld [vmem:[%s4013_s30 + $0xb8] sm:$0xff] }
 0x4ef   : > { %v2812_v54 = vadd.f32 %v3629_v61, %v2780_v10  ;;  %2833 = vst.msk [vmem:[%s5818_s17 + $0x18] sm:$0xff] %vm609_vm7, %v2801_v49  ;;  %2834 = vst.msk [vmem:[%s5818_s17 + $0x20] sm:$0xff] %vm609_vm7, %v2802_v40  ;;  %v2813_v58 = vadd.f32 %v3630_v4, %v2781_v7  ;;  %v2814_v13 = vadd.f32 %v3631_v24, %v2782_v14  ;;  %v3639_v7 = vld [vmem:[%s4013_s30 + $0xc0] sm:$0xff] }
 0x4f0   : > { %2835 = vst.msk [vmem:[%s5818_s17 + $0x28] sm:$0xff] %vm609_vm7, %v2803_v19  ;;  %2836 = vst.msk [vmem:[%s5818_s17 + $0x30] sm:$0xff] %vm609_vm7, %v2804_v45  ;;  %v2815_v25 = vadd.f32 %v3632_v37, %v2783_v22  ;;  %v2816_v56 = vadd.f32 %v3633_v43, %v2784_v44  ;;  %v2817_v9 = vadd.f32 %v3634_v52, %v5822_v28  ;;  %v3640_v22 = vld [vmem:[%s4013_s30 + $0xc8] sm:$0xff]  ;;  %v3641_v28 = vld [vmem:[%s4013_s30 + $0xd0] sm:$0xff] }
 0x4f1   : > { %2837 = vst.msk [vmem:[%s5818_s17 + $0x38] sm:$0xff] %vm609_vm7, %v2805_v23  ;;  %2838 = vst.msk [vmem:[%s5818_s17 + $0x40] sm:$0xff] %vm609_vm7, %v2806_v33  ;;  %v2818_v41 = vadd.f32 %v3635_v53, %v5824_v51  ;;  %v2819_v21 = vadd.f32 %v3636_v39, %v5826_v5  ;;  %v2820_v26 = vadd.f32 %v3637_v11, %v5828_v6  ;;  %v3642_v5 = vld [vmem:[%s4013_s30 + $0xd8] sm:$0xff] }
 0x4f2   : > { %2839 = vst.msk [vmem:[%s5818_s17 + $0x48] sm:$0xff] %vm609_vm7, %v2807_v1  ;;  %2840 = vst.msk [vmem:[%s5818_s17 + $0x50] sm:$0xff] %vm609_vm7, %v2808_v62  ;;  %v2821_v10 = vadd.f32 %v3638_v32, %v5830_v42  ;;  %v2822_v14 = vadd.f32 %v3639_v7, %v5832_v20  ;;  %v2823_v44 = vadd.f32 %v3640_v22, %v5834_v63  ;;  %v3643_v42 = vld [vmem:[%s4013_s30 + $0xe0] sm:$0xff]  ;;  %v3644_v63 = vld [vmem:[%s4013_s30 + $0xf0] sm:$0xff] }
 0x4f3   : > { %2841 = vst.msk [vmem:[%s5818_s17 + $0x58] sm:$0xff] %vm609_vm7, %v2809_v47  ;;  %2842 = vst.msk [vmem:[%s5818_s17 + $0x60] sm:$0xff] %vm609_vm7, %v2810_v38  ;;  %v2824_v51 = vadd.f32 %v3641_v28, %v5836_v18  ;;  %v2825_v6 = vadd.f32 %v3642_v5, %v5838_v46  ;;  %v2826_v20 = vadd.f32 %v3643_v42, %v5840_v59 }
 0x4f4   : > { %2843 = vst.msk [vmem:[%s5818_s17 + $0x68] sm:$0xff] %vm609_vm7, %v2811_v16  ;;  %2844 = vst.msk [vmem:[%s5818_s17 + $0x70] sm:$0xff] %vm609_vm7, %v2812_v54  ;;  %v2828_v18 = vadd.f32 %v3644_v63, %v5842_v55  ;;  %v2829_v2 = vadd.f32 %v3645_v12, %v5844_v34 }
 0x4f5   : > { %2845 = vst.msk [vmem:[%s5818_s17 + $0x78] sm:$0xff] %vm609_vm7, %v2813_v58  ;;  %2846 = vst.msk [vmem:[%s5818_s17 + $0x80] sm:$0xff] %vm609_vm7, %v2814_v13 }
 0x4f6   : > { %2847 = vst.msk [vmem:[%s5818_s17 + $0x88] sm:$0xff] %vm609_vm7, %v2815_v25  ;;  %2848 = vst.msk [vmem:[%s5818_s17 + $0x90] sm:$0xff] %vm609_vm7, %v2816_v56 }
 0x4f7   : > { %2849 = vst.msk [vmem:[%s5818_s17 + $0x98] sm:$0xff] %vm609_vm7, %v2817_v9  ;;  %2850 = vst.msk [vmem:[%s5818_s17 + $0xa0] sm:$0xff] %vm609_vm7, %v2818_v41 }
 0x4f8   : > { %2851 = vst.msk [vmem:[%s5818_s17 + $0xa8] sm:$0xff] %vm609_vm7, %v2819_v21  ;;  %2852 = vst.msk [vmem:[%s5818_s17 + $0xb0] sm:$0xff] %vm609_vm7, %v2820_v26 }
 0x4f9   : > { %2853 = vst.msk [vmem:[%s5818_s17 + $0xb8] sm:$0xff] %vm609_vm7, %v2821_v10  ;;  %2854 = vst.msk [vmem:[%s5818_s17 + $0xc0] sm:$0xff] %vm609_vm7, %v2822_v14 }
 0x4fa   : > { %2855 = vst.msk [vmem:[%s5818_s17 + $0xc8] sm:$0xff] %vm609_vm7, %v2823_v44  ;;  %2856 = vst.msk [vmem:[%s5818_s17 + $0xd0] sm:$0xff] %vm609_vm7, %v2824_v51 }
 0x4fb   : > { %2857 = vst.msk [vmem:[%s5818_s17 + $0xd8] sm:$0xff] %vm609_vm7, %v2825_v6  ;;  %2858 = vst.msk [vmem:[%s5818_s17 + $0xe0] sm:$0xff] %vm609_vm7, %v2826_v20 }
 0x4fc   : > { %2860 = vst.msk [vmem:[%s5818_s17 + $0xf0] sm:$0xff] %vm609_vm7, %v2828_v18  ;;  %2861 = vst.msk [vmem:[%s5818_s17 + $0xf8] sm:$0xff] %vm609_vm7, %v2829_v2 }
 0x4fd   : > { %3745 = shalt.err (!%p3742_p2)
}
 0x4fe   : > { %s3746_s8 = scalar_lea.hbm %s5926_s5, 4096  ;;  %s3750_s29 = scalar_lea.hbm %s6010_s3, 8192 }
 0x4ff   : > { %p3747_p13 = scmp.ne.s32.totalorder %s5926_s5, %s3746_s8  ;;  %p3751_p4 = scmp.lt.u32.totalorder %s5926_s5, %s6010_s3 }
 0x500   : > { %p3752_p5 = scmp.lt.u32.totalorder %s3750_s29, %s3746_s8  ;;  %p3754_p11 = scmp.lt.u32.totalorder %s3746_s8, %s5926_s5 }
 0x501   : > { %p3748_p6 = pnand %p3747_p13, %p6038_p0 }
 0x502   : > { %p3753_p8 = por %p3752_p5, %p3751_p4 }
 0x503   : > { %p3749_p10 = pneg %p3748_p6 }
 0x504   : > { %p3755_p1 = por %p3754_p11, %p3753_p8 }
 0x506   : > { %p3756_p3 = pnand %p3755_p1, %p3749_p10 }
 0x508   : > { %3759 = shalt.err (!%p3756_p3)
}
 0x509   : > { %s3814_s17 = smov 128  }
 0x50a   : > { %3540 = dma.vmem_to_hbm [thread:$0]  (%p6038_p0), %s5946_s26, 4096, %s5926_s5, %s2863_s16, %s3814_s17, %s3814_s17, %s3812_s20  }
 0x50b PF: > { %s2891_s24 = sand.u32 1, %s3790_s12   ;;  %p6039_p7 = scmp.ne.s32.totalorder %s6015_s19, 0 }
 0x50c   : > { %p6040_p9 = scmp.ge.s32.totalorder %s3802_s15, 2  ;;  %s2892_s27 = scalar_lea.sflag [#allocation4], %s2891_s24 }
 0x50e   : > { %p3554_p12 = pnand %p6040_p9, %p6039_p7 }
 0x510   : > { %3785 = dma.done.wait (!%p3554_p12), %s2892_s27, 4096  }
 0x511   : > { %3787 = vsyncadd (!%p3554_p12), %s2892_s27, 4294963200  ;;  %p17_p2 = scmp.ge.s32.totalorder %s3945_s4, 4   ;;  %s6041_s12 = smov %s3794_s13 }
 0x512   : > { %s6042_s13 = smov %s3798_s14  ;;  %s6043_s14 = smov %s3961_s9 }
 0x513   : > { %s6044_s15 = smov %s3945_s4  ;;  %19 = sbr.rel (!%p17_p2) target bundleno = 6 (0x6), region = 89 }
 0x51a   :  { %2897 = vsyncpa [#allocation3], 1 }
 0x51b   :  { %2899 = vsyncpa [#allocation3 + $0x1], 1 }
 0x51c   :  { %2900 = vsyncpa [#allocation6], 1 }
 0x51d   :  { %2901 = vsyncpa [#allocation4], 1 }
 0x51e   :  { %2903 = vsyncpa [#allocation4 + $0x1], 1 }

</bundles_post_ra>
